<compile_context>
chip_gen: v6e
topology: v6e:2x2x1
jax: 0.10.0
libtpu: 0.0.40
codegen_flags: <defaults>
</compile_context>

<pallas_src>
import numpy as np
import jax
import jax.numpy as jnp
from jax.experimental import pallas as pl
from jax.experimental.pallas import tpu as pltpu


# ----------------------------------------------------------------------------
# Kernel
# ----------------------------------------------------------------------------
def _make_kernel(T, F, num_highways, mm_dtype):
    def kernel(ids_ref, rep_ref, charid_ref, embb_ref, wcat_ref, mask_ref,
               convb_ref, hw_w_ref, hw_b_ref, proj_w_ref, proj_b_ref, out_ref):
        # ---- replicate ids across the V lanes of each char position (MXU) ----
        ids_f = ids_ref[...].astype(jnp.float32)                  # (tm, T)
        ids_rep = jnp.dot(ids_f, rep_ref[...],
                          preferred_element_type=jnp.float32)     # (tm, T*V)

        # ---- fused embedding gather: full-width one-hot @ block-diag table ----
        onehot = (ids_rep == charid_ref[...]).astype(mm_dtype)    # (tm, T*V)
        x = jnp.dot(onehot, embb_ref[...],
                    preferred_element_type=jnp.float32)           # (tm, T*E)
        x = x.astype(mm_dtype)

        # ---- char CNN: ONE wide matmul, masked max over 128-lane slices ------
        s = jnp.dot(x, wcat_ref[...],
                    preferred_element_type=jnp.float32)           # (tm, T*F)
        s = s + mask_ref[...]                                     # -1e30 on invalid pos
        best = s[:, 0:F]
        for t in range(1, T):
            best = jnp.maximum(best, s[:, t * F:(t + 1) * F])
        feat = jnp.maximum(best + convb_ref[...], 0.0)            # (tm, F) f32

        # ---- Highway layers (h + g*(x-h) == g*x + (1-g)*h, exact) ------------
        for l in range(num_highways):
            proj = jnp.dot(feat.astype(mm_dtype), hw_w_ref[l],
                           preferred_element_type=jnp.float32) + hw_b_ref[l]
            hidden = jnp.maximum(proj[:, :F], 0.0)
            gate = jax.nn.sigmoid(proj[:, F:])
            feat = hidden + gate * (feat - hidden)

        # ---- output projection (lane-dense: padded to Dp columns) ------------
        out = jnp.dot(feat.astype(mm_dtype), proj_w_ref[...],
                      preferred_element_type=jnp.float32) + proj_b_ref[...]
        out_ref[...] = out.astype(out_ref.dtype)

    return kernel


# ----------------------------------------------------------------------------
# One-time weight preprocessing (numpy, hoisted out of the per-call path)
# ----------------------------------------------------------------------------
def prepare_params(emb_table, conv_ws, conv_bs, hw_w, hw_b, proj_w, proj_b,
                   *, filters, num_highways, token_len, use_bf16=True):
    T = int(token_len)
    V, E = emb_table.shape
    F = sum(c for _, c in filters)
    D = proj_w.shape[1]
    Dp = ((D + 127) // 128) * 128                      # lane-dense output width
    mm_dtype = jnp.bfloat16 if use_bf16 else jnp.float32

    for k, _ in filters:
        assert k <= T, f"conv kernel size {k} exceeds token_len {T}"

    emb_np = np.asarray(emb_table, np.float32)         # (V, E)

    # block-diagonal embedding table: one_hot(ids) @ emb_block == gather
    emb_block = np.zeros((T * V, T * E), np.float32)
    for p in range(T):
        emb_block[p * V:(p + 1) * V, p * E:(p + 1) * E] = emb_np

    # ids lane-replication matrix and per-lane char-id pattern
    rep = np.zeros((T, T * V), np.float32)
    for p in range(T):
        rep[p, p * V:(p + 1) * V] = 1.0
    charid = np.tile(np.arange(V, dtype=np.float32), T).reshape(1, T * V)

    # merged per-position conv weights (T*E, T*F) + additive validity mask
    wcat = np.zeros((T * E, T * F), np.float32)
    mask = np.zeros((1, T * F), np.float32)
    off = 0
    for fi, (k, c) in enumerate(filters):
        w = np.asarray(conv_ws[fi], np.float32)        # (k, E, c)
        for t in range(T):
            base = t * F + off
            if t + k <= T:                             # valid conv position
                for j in range(k):
                    wcat[(t + j) * E:(t + j + 1) * E, base:base + c] = w[j]
            else:                                      # mask out of the max
                mask[0, base:base + c] = -1e30
        off += c
    conv_b = np.concatenate([np.asarray(b, np.float32).reshape(1, -1)
                             for b in conv_bs], axis=-1)          # (1, F)

    # zero-pad projection to a lane-dense 128-wide output slab
    proj_w_p = np.zeros((F, Dp), np.float32)
    proj_w_p[:, :D] = np.asarray(proj_w, np.float32)
    proj_b_p = np.zeros((1, Dp), np.float32)
    proj_b_p[0, :D] = np.asarray(proj_b, np.float32).reshape(-1)

    return dict(
        T=T, V=int(V), E=int(E), F=int(F), D=int(D), Dp=int(Dp),
        L=int(num_highways), mm_dtype=mm_dtype,
        rep=jnp.asarray(rep),
        charid=jnp.asarray(charid),
        emb_block=jnp.asarray(emb_block, mm_dtype),
        wcat=jnp.asarray(wcat, mm_dtype),
        mask=jnp.asarray(mask),
        conv_b=jnp.asarray(conv_b),
        hw_w=jnp.asarray(hw_w, mm_dtype),               # (L, F, 2F)
        hw_b=jnp.asarray(hw_b, jnp.float32),            # (L, 1, 2F)
        proj_w=jnp.asarray(proj_w_p, mm_dtype),         # (F, Dp)
        proj_b=jnp.asarray(proj_b_p),                   # (1, Dp)
    )


# ----------------------------------------------------------------------------
# Tile-size selection
# ----------------------------------------------------------------------------
def _round_up(x, m):
    return ((x + m - 1) // m) * m


def _choose_tm(N, tm_max=1024):
    """Largest useful row tile: <= tm_max, sublane-aligned, and >= 2 grid steps
    when N is big enough (so v7x's 2 TensorCores both get work)."""
    if N > tm_max:
        return tm_max
    if N >= 512:
        return _round_up(pl.cdiv(N, 2), 256)            # exactly 2 tiles
    return _round_up(max(N, 8), 8)                       # tiny problem: one tile


# ----------------------------------------------------------------------------
# Forward wrapper
# ----------------------------------------------------------------------------
def conv_token_embedder(inputs, params, *, tm=None):
    """inputs: (B, S, T) int32 char ids. Returns (B, S, D) float32."""
    B, S, T_in = inputs.shape
    T, V, E, F, D, Dp, L = (params[k] for k in
                            ("T", "V", "E", "F", "D", "Dp", "L"))
    assert T_in == T, (T_in, T)
    mm_dtype = params["mm_dtype"]
    N = B * S

    if tm is None:
        tm = _choose_tm(N)
    num_tiles = pl.cdiv(N, tm)
    n_pad = num_tiles * tm

    ids = inputs.reshape(N, T).astype(jnp.int32)
    if n_pad != N:                        # padded rows are sliced off below
        ids = jnp.pad(ids, ((0, n_pad - N), (0, 0)))

    kernel = _make_kernel(T, F, L, mm_dtype)

    weight_args = (params["rep"], params["charid"], params["emb_block"],
                   params["wcat"], params["mask"], params["conv_b"],
                   params["hw_w"], params["hw_b"], params["proj_w"],
                   params["proj_b"])

    def full_spec(arr):
        nd = arr.ndim
        return pl.BlockSpec(arr.shape, lambda i, nd=nd: (0,) * nd)

    in_specs = [pl.BlockSpec((tm, T), lambda i: (i, 0))]
    in_specs += [full_spec(a) for a in weight_args]

    flops = 2 * n_pad * (T * (T * V)              # id lane replication
                         + (T * V) * (T * E)      # fused embedding gather
                         + (T * E) * (T * F)      # merged char CNN
                         + L * F * (2 * F)        # highway layers
                         + F * Dp)                # output projection
    transcendentals = n_pad * L * F               # sigmoid gates
    bytes_accessed = int(ids.size) * 4 + n_pad * Dp * 4 + sum(
        int(np.prod(a.shape)) * a.dtype.itemsize for a in weight_args)

    out = pl.pallas_call(
        kernel,
        out_shape=jax.ShapeDtypeStruct((n_pad, Dp), jnp.float32),
        grid_spec=pltpu.PrefetchScalarGridSpec(
            num_scalar_prefetch=0,
            grid=(num_tiles,),
            in_specs=in_specs,
            out_specs=pl.BlockSpec((tm, Dp), lambda i: (i, 0)),
        ),
        compiler_params=pltpu.CompilerParams(
            dimension_semantics=("parallel",),
            vmem_limit_bytes=48 * 1024 * 1024,    # v5e default (16 MiB) too low for tm=1024
        ),
        cost_estimate=pl.CostEstimate(
            flops=flops, transcendentals=transcendentals,
            bytes_accessed=bytes_accessed),
    )(ids, *weight_args)

    return out[:N, :D].reshape(B, S, D)


# ----------------------------------------------------------------------------
# Pure-JAX reference (same math as the PyTorch module, for verification)
# ----------------------------------------------------------------------------
def reference(inputs, emb_table, conv_ws, conv_bs, hw_w, hw_b, proj_w, proj_b,
              *, filters, num_highways):
    B, S, T = inputs.shape
    F = sum(c for _, c in filters)
    x = jnp.take(emb_table, inputs.reshape(B * S, T), axis=0)   # (N, T, E)
    feats = []
    for fi, (k, c) in enumerate(filters):
        pos = []
        for t in range(T - k + 1):
            acc = sum(x[:, t + j, :] @ conv_ws[fi][j] for j in range(k))
            pos.append(acc + conv_bs[fi][0])
        conv = jnp.stack(pos, axis=-1)                          # (N, c, n_pos)
        feats.append(jax.nn.relu(jnp.max(conv, axis=-1)))
    feat = jnp.concatenate(feats, axis=-1)
    for l in range(num_highways):
        proj = feat @ hw_w[l] + hw_b[l, 0]
        hidden = jax.nn.relu(proj[:, :F])
        gate = jax.nn.sigmoid(proj[:, F:])
        feat = gate * feat + (1.0 - gate) * hidden
    out = feat @ proj_w + proj_b[0]
    return out.reshape(B, S, -1)


# ----------------------------------------------------------------------------
# Main
# ----------------------------------------------------------------------------
if __name__ == "__main__":
    # module hyper-parameters (small, consistent with the PyTorch module)
    vocab_size = 64
    char_embedding_dim = 16
    char_conv_filters = [(1, 32), (2, 32), (3, 64)]   # (kernel_size, out_channels)
    num_highways = 2
    output_dim = 64
    num_filters = sum(c for _, c in char_conv_filters)  # 128

    B, S, T = 2, 8, 8   # batch, seq_len, token_len  -> N = 16 tokens

    key = jax.random.PRNGKey(0)
    keys = jax.random.split(key, 16)

    # deterministic synthetic parameters (mirroring __init__ shapes)
    emb_table = jax.random.uniform(keys[0], (vocab_size, char_embedding_dim),
                                   jnp.float32, -0.25, 0.25)

    conv_ws, conv_bs = [], []
    for i, (k, c) in enumerate(char_conv_filters):
        # PyTorch Conv1d weight is (C_out, E, k); stored here as (k, E, C_out)
        conv_ws.append(0.1 * jax.random.normal(
            keys[1 + i], (k, char_embedding_dim, c), jnp.float32))
        conv_bs.append(0.1 * jax.random.normal(keys[4 + i], (1, c), jnp.float32))

    # Highway: Linear(F -> 2F) per layer; stored transposed as (F, 2F)
    hw_w = 0.1 * jax.random.normal(
        keys[8], (num_highways, num_filters, 2 * num_filters), jnp.float32)
    hw_b = 0.1 * jax.random.normal(
        keys[9], (num_highways, 1, 2 * num_filters), jnp.float32)
    # mirror the Highway init: bias[input_dim:] = 1
    hw_b = hw_b.at[:, :, num_filters:].set(1.0)

    proj_w = 0.1 * jax.random.normal(keys[10], (num_filters, output_dim), jnp.float32)
    proj_b = 0.1 * jax.random.normal(keys[11], (1, output_dim), jnp.float32)

    # deterministic inputs: (B, S, T) char ids
    inputs = jax.random.randint(keys[12], (B, S, T), 0, vocab_size, jnp.int32)

    ref = reference(
        inputs, emb_table, conv_ws, conv_bs, hw_w, hw_b, proj_w, proj_b,
        filters=char_conv_filters, num_highways=num_highways)

    # exact (f32) path: strict check
    prep_f32 = prepare_params(
        emb_table, conv_ws, conv_bs, hw_w, hw_b, proj_w, proj_b,
        filters=char_conv_filters, num_highways=num_highways,
        token_len=T, use_bf16=False)
    out_f32 = conv_token_embedder(inputs, prep_f32)
    out_f32 = jax.block_until_ready(out_f32)
    assert out_f32.shape == (B, S, output_dim), out_f32.shape
    assert jnp.allclose(out_f32, ref, atol=1e-3, rtol=1e-3), (
        float(jnp.max(jnp.abs(out_f32 - ref))))

    # fast (bf16 matmul, f32 accumulate/elementwise) path: loose check
    prep_bf16 = prepare_params(
        emb_table, conv_ws, conv_bs, hw_w, hw_b, proj_w, proj_b,
        filters=char_conv_filters, num_highways=num_highways,
        token_len=T, use_bf16=True)
    out_bf16 = conv_token_embedder(inputs, prep_bf16)
    out_bf16 = jax.block_until_ready(out_bf16)
    assert out_bf16.shape == (B, S, output_dim), out_bf16.shape
    assert jnp.allclose(out_bf16, ref, atol=1e-1, rtol=1e-1), (
        float(jnp.max(jnp.abs(out_bf16 - ref))))

    print("KERNEL_OK")
</pallas_src>

<mosaic_0001>
module attributes {stable_mosaic.version = 11 : i64} {
  func.func @kernel(%arg0: i32, %arg1: memref<16x8xi32, #tpu.memory_space<vmem>>, %arg2: memref<8x512xf32, #tpu.memory_space<vmem>>, %arg3: memref<1x512xf32, #tpu.memory_space<vmem>>, %arg4: memref<512x128xf32, #tpu.memory_space<vmem>>, %arg5: memref<128x1024xf32, #tpu.memory_space<vmem>>, %arg6: memref<1x1024xf32, #tpu.memory_space<vmem>>, %arg7: memref<1x128xf32, #tpu.memory_space<vmem>>, %arg8: memref<2x128x256xf32, #tpu.memory_space<vmem>>, %arg9: memref<2x1x256xf32, #tpu.memory_space<vmem>>, %arg10: memref<128x128xf32, #tpu.memory_space<vmem>>, %arg11: memref<1x128xf32, #tpu.memory_space<vmem>>, %arg12: memref<16x128xf32, #tpu.memory_space<vmem>>) attributes {dimension_semantics = [#tpu.dimension_semantics<parallel>], iteration_bounds = array<i64: 1>, scalar_prefetch = 0 : i64, scratch_operands = 0 : i64, tpu.core_type = #tpu.core_type<tc>, window_params = [{transform_indices = @transform_0, window_bounds = array<i64: 16, 8>}, {pipeline_mode = #tpu.pipeline_mode<synchronous>, transform_indices = @transform_1, window_bounds = array<i64: 8, 512>}, {pipeline_mode = #tpu.pipeline_mode<synchronous>, transform_indices = @transform_2, window_bounds = array<i64: 1, 512>}, {pipeline_mode = #tpu.pipeline_mode<synchronous>, transform_indices = @transform_3, window_bounds = array<i64: 512, 128>}, {pipeline_mode = #tpu.pipeline_mode<synchronous>, transform_indices = @transform_4, window_bounds = array<i64: 128, 1024>}, {pipeline_mode = #tpu.pipeline_mode<synchronous>, transform_indices = @transform_5, window_bounds = array<i64: 1, 1024>}, {pipeline_mode = #tpu.pipeline_mode<synchronous>, transform_indices = @transform_6, window_bounds = array<i64: 1, 128>}, {pipeline_mode = #tpu.pipeline_mode<synchronous>, transform_indices = @transform_7, window_bounds = array<i64: 2, 128, 256>}, {pipeline_mode = #tpu.pipeline_mode<synchronous>, transform_indices = @transform_8, window_bounds = array<i64: 2, 1, 256>}, {pipeline_mode = #tpu.pipeline_mode<synchronous>, transform_indices = @transform_9, window_bounds = array<i64: 128, 128>}, {pipeline_mode = #tpu.pipeline_mode<synchronous>, transform_indices = @transform_10, window_bounds = array<i64: 1, 128>}, {transform_indices = @transform_11, window_bounds = array<i64: 16, 128>}]} {
    %c0 = arith.constant 0 : index
    %c0_0 = arith.constant 0 : index
    %0 = vector.load %arg1[%c0, %c0_0] : memref<16x8xi32, #tpu.memory_space<vmem>>, vector<16x8xi32>
    %1 = arith.sitofp %0 : vector<16x8xi32> to vector<16x8xf32>
    %c0_1 = arith.constant 0 : index
    %c0_2 = arith.constant 0 : index
    %2 = vector.load %arg2[%c0_1, %c0_2] : memref<8x512xf32, #tpu.memory_space<vmem>>, vector<8x512xf32>
    %cst = arith.constant dense<0.000000e+00> : vector<16x512xf32>
    %3 = tpu.matmul %1, %2, %cst {dimension_numbers = #tpu.dot_dimension_numbers<[1], [0], [0], [1], [0, 0, 1, 1], [], []>} : vector<16x8xf32>, vector<8x512xf32>, vector<16x512xf32> -> vector<16x512xf32>
    %c0_3 = arith.constant 0 : index
    %c0_4 = arith.constant 0 : index
    %4 = vector.load %arg3[%c0_3, %c0_4] : memref<1x512xf32, #tpu.memory_space<vmem>>, vector<1x512xf32>
    %5 = vector.broadcast %4 : vector<1x512xf32> to vector<16x512xf32>
    %6 = arith.cmpf oeq, %3, %5 : vector<16x512xf32>
    %7 = arith.extui %6 : vector<16x512xi1> to vector<16x512xi32>
    %8 = arith.sitofp %7 : vector<16x512xi32> to vector<16x512xf32>
    %c0_5 = arith.constant 0 : index
    %c0_6 = arith.constant 0 : index
    %9 = vector.load %arg4[%c0_5, %c0_6] : memref<512x128xf32, #tpu.memory_space<vmem>>, vector<512x128xf32>
    %cst_7 = arith.constant dense<0.000000e+00> : vector<16x128xf32>
    %10 = tpu.matmul %8, %9, %cst_7 {dimension_numbers = #tpu.dot_dimension_numbers<[1], [0], [0], [1], [0, 0, 1, 1], [], []>} : vector<16x512xf32>, vector<512x128xf32>, vector<16x128xf32> -> vector<16x128xf32>
    %c0_8 = arith.constant 0 : index
    %c0_9 = arith.constant 0 : index
    %11 = vector.load %arg5[%c0_8, %c0_9] : memref<128x1024xf32, #tpu.memory_space<vmem>>, vector<128x1024xf32>
    %cst_10 = arith.constant dense<0.000000e+00> : vector<16x1024xf32>
    %12 = tpu.matmul %10, %11, %cst_10 {dimension_numbers = #tpu.dot_dimension_numbers<[1], [0], [0], [1], [0, 0, 1, 1], [], []>} : vector<16x128xf32>, vector<128x1024xf32>, vector<16x1024xf32> -> vector<16x1024xf32>
    %c0_11 = arith.constant 0 : index
    %c0_12 = arith.constant 0 : index
    %13 = vector.load %arg6[%c0_11, %c0_12] : memref<1x1024xf32, #tpu.memory_space<vmem>>, vector<1x1024xf32>
    %14 = vector.broadcast %13 : vector<1x1024xf32> to vector<16x1024xf32>
    %15 = arith.addf %12, %14 : vector<16x1024xf32>
    %16 = vector.extract_strided_slice %15 {offsets = [0, 0], sizes = [16, 128], strides = [1, 1]} : vector<16x1024xf32> to vector<16x128xf32>
    %17 = vector.extract_strided_slice %15 {offsets = [0, 128], sizes = [16, 128], strides = [1, 1]} : vector<16x1024xf32> to vector<16x128xf32>
    %18 = arith.maximumf %16, %17 : vector<16x128xf32>
    %19 = vector.extract_strided_slice %15 {offsets = [0, 256], sizes = [16, 128], strides = [1, 1]} : vector<16x1024xf32> to vector<16x128xf32>
    %20 = arith.maximumf %18, %19 : vector<16x128xf32>
    %21 = vector.extract_strided_slice %15 {offsets = [0, 384], sizes = [16, 128], strides = [1, 1]} : vector<16x1024xf32> to vector<16x128xf32>
    %22 = arith.maximumf %20, %21 : vector<16x128xf32>
    %23 = vector.extract_strided_slice %15 {offsets = [0, 512], sizes = [16, 128], strides = [1, 1]} : vector<16x1024xf32> to vector<16x128xf32>
    %24 = arith.maximumf %22, %23 : vector<16x128xf32>
    %25 = vector.extract_strided_slice %15 {offsets = [0, 640], sizes = [16, 128], strides = [1, 1]} : vector<16x1024xf32> to vector<16x128xf32>
    %26 = arith.maximumf %24, %25 : vector<16x128xf32>
    %27 = vector.extract_strided_slice %15 {offsets = [0, 768], sizes = [16, 128], strides = [1, 1]} : vector<16x1024xf32> to vector<16x128xf32>
    %28 = arith.maximumf %26, %27 : vector<16x128xf32>
    %29 = vector.extract_strided_slice %15 {offsets = [0, 896], sizes = [16, 128], strides = [1, 1]} : vector<16x1024xf32> to vector<16x128xf32>
    %30 = arith.maximumf %28, %29 : vector<16x128xf32>
    %c0_13 = arith.constant 0 : index
    %c0_14 = arith.constant 0 : index
    %31 = vector.load %arg7[%c0_13, %c0_14] : memref<1x128xf32, #tpu.memory_space<vmem>>, vector<1x128xf32>
    %32 = vector.broadcast %31 : vector<1x128xf32> to vector<16x128xf32>
    %33 = arith.addf %30, %32 : vector<16x128xf32>
    %cst_15 = arith.constant 0.000000e+00 : f32
    %34 = vector.broadcast %cst_15 : f32 to vector<16x128xf32>
    %35 = arith.maximumf %33, %34 : vector<16x128xf32>
    %c0_16 = arith.constant 0 : index
    %c0_17 = arith.constant 0 : index
    %c0_18 = arith.constant 0 : index
    %36 = vector.load %arg8[%c0_16, %c0_17, %c0_18] : memref<2x128x256xf32, #tpu.memory_space<vmem>>, vector<1x128x256xf32>
    %37 = vector.shape_cast %36 : vector<1x128x256xf32> to vector<128x256xf32>
    %cst_19 = arith.constant dense<0.000000e+00> : vector<16x256xf32>
    %38 = tpu.matmul %35, %37, %cst_19 {dimension_numbers = #tpu.dot_dimension_numbers<[1], [0], [0], [1], [0, 0, 1, 1], [], []>} : vector<16x128xf32>, vector<128x256xf32>, vector<16x256xf32> -> vector<16x256xf32>
    %c0_20 = arith.constant 0 : index
    %c0_21 = arith.constant 0 : index
    %c0_22 = arith.constant 0 : index
    %39 = vector.load %arg9[%c0_20, %c0_21, %c0_22] : memref<2x1x256xf32, #tpu.memory_space<vmem>>, vector<1x1x256xf32>
    %40 = vector.shape_cast %39 : vector<1x1x256xf32> to vector<1x256xf32>
    %41 = vector.broadcast %40 : vector<1x256xf32> to vector<16x256xf32>
    %42 = arith.addf %38, %41 : vector<16x256xf32>
    %43 = vector.extract_strided_slice %42 {offsets = [0, 0], sizes = [16, 128], strides = [1, 1]} : vector<16x256xf32> to vector<16x128xf32>
    %cst_23 = arith.constant 0.000000e+00 : f32
    %44 = vector.broadcast %cst_23 : f32 to vector<16x128xf32>
    %45 = arith.maximumf %43, %44 : vector<16x128xf32>
    %46 = vector.extract_strided_slice %42 {offsets = [0, 128], sizes = [16, 128], strides = [1, 1]} : vector<16x256xf32> to vector<16x128xf32>
    %47 = arith.negf %46 : vector<16x128xf32>
    %48 = math.exp %47 : vector<16x128xf32>
    %cst_24 = arith.constant 1.000000e+00 : f32
    %49 = vector.broadcast %cst_24 : f32 to vector<16x128xf32>
    %50 = arith.addf %49, %48 : vector<16x128xf32>
    %51 = arith.divf %49, %50 : vector<16x128xf32>
    %52 = arith.subf %35, %45 : vector<16x128xf32>
    %53 = arith.mulf %51, %52 : vector<16x128xf32>
    %54 = arith.addf %45, %53 : vector<16x128xf32>
    %c1 = arith.constant 1 : index
    %c0_25 = arith.constant 0 : index
    %c0_26 = arith.constant 0 : index
    %55 = vector.load %arg8[%c1, %c0_25, %c0_26] : memref<2x128x256xf32, #tpu.memory_space<vmem>>, vector<1x128x256xf32>
    %56 = vector.shape_cast %55 : vector<1x128x256xf32> to vector<128x256xf32>
    %cst_27 = arith.constant dense<0.000000e+00> : vector<16x256xf32>
    %57 = tpu.matmul %54, %56, %cst_27 {dimension_numbers = #tpu.dot_dimension_numbers<[1], [0], [0], [1], [0, 0, 1, 1], [], []>} : vector<16x128xf32>, vector<128x256xf32>, vector<16x256xf32> -> vector<16x256xf32>
    %c1_28 = arith.constant 1 : index
    %c0_29 = arith.constant 0 : index
    %c0_30 = arith.constant 0 : index
    %58 = vector.load %arg9[%c1_28, %c0_29, %c0_30] : memref<2x1x256xf32, #tpu.memory_space<vmem>>, vector<1x1x256xf32>
    %59 = vector.shape_cast %58 : vector<1x1x256xf32> to vector<1x256xf32>
    %60 = vector.broadcast %59 : vector<1x256xf32> to vector<16x256xf32>
    %61 = arith.addf %57, %60 : vector<16x256xf32>
    %62 = vector.extract_strided_slice %61 {offsets = [0, 0], sizes = [16, 128], strides = [1, 1]} : vector<16x256xf32> to vector<16x128xf32>
    %cst_31 = arith.constant 0.000000e+00 : f32
    %63 = vector.broadcast %cst_31 : f32 to vector<16x128xf32>
    %64 = arith.maximumf %62, %63 : vector<16x128xf32>
    %65 = vector.extract_strided_slice %61 {offsets = [0, 128], sizes = [16, 128], strides = [1, 1]} : vector<16x256xf32> to vector<16x128xf32>
    %66 = arith.negf %65 : vector<16x128xf32>
    %67 = math.exp %66 : vector<16x128xf32>
    %cst_32 = arith.constant 1.000000e+00 : f32
    %68 = vector.broadcast %cst_32 : f32 to vector<16x128xf32>
    %69 = arith.addf %68, %67 : vector<16x128xf32>
    %70 = arith.divf %68, %69 : vector<16x128xf32>
    %71 = arith.subf %54, %64 : vector<16x128xf32>
    %72 = arith.mulf %70, %71 : vector<16x128xf32>
    %73 = arith.addf %64, %72 : vector<16x128xf32>
    %c0_33 = arith.constant 0 : index
    %c0_34 = arith.constant 0 : index
    %74 = vector.load %arg10[%c0_33, %c0_34] : memref<128x128xf32, #tpu.memory_space<vmem>>, vector<128x128xf32>
    %cst_35 = arith.constant dense<0.000000e+00> : vector<16x128xf32>
    %75 = tpu.matmul %73, %74, %cst_35 {dimension_numbers = #tpu.dot_dimension_numbers<[1], [0], [0], [1], [0, 0, 1, 1], [], []>} : vector<16x128xf32>, vector<128x128xf32>, vector<16x128xf32> -> vector<16x128xf32>
    %c0_36 = arith.constant 0 : index
    %c0_37 = arith.constant 0 : index
    %76 = vector.load %arg11[%c0_36, %c0_37] : memref<1x128xf32, #tpu.memory_space<vmem>>, vector<1x128xf32>
    %77 = vector.broadcast %76 : vector<1x128xf32> to vector<16x128xf32>
    %78 = arith.addf %75, %77 : vector<16x128xf32>
    %c0_38 = arith.constant 0 : index
    %c0_39 = arith.constant 0 : index
    %79 = vector.load %arg12[%c0_38, %c0_39] : memref<16x128xf32, #tpu.memory_space<vmem>>, vector<16x128xf32>
    tpu.vector_store %arg12[%c0_38, %c0_39], %78 {strides = array<i32>} : memref<16x128xf32, #tpu.memory_space<vmem>>, vector<16x128xf32>,
    return
  }
  func.func @transform_0(%arg0: i32) -> (i32, i32) {
    %c0_i32 = arith.constant 0 : i32
    %c0_i32_0 = arith.constant 0 : i32
    return %arg0, %c0_i32 : i32, i32
  }
  func.func @transform_1(%arg0: i32) -> (i32, i32) {
    %c0_i32 = arith.constant 0 : i32
    %c0_i32_0 = arith.constant 0 : i32
    %c0_i32_1 = arith.constant 0 : i32
    return %c0_i32, %c0_i32_0 : i32, i32
  }
  func.func @transform_2(%arg0: i32) -> (i32, i32) {
    %c0_i32 = arith.constant 0 : i32
    %c0_i32_0 = arith.constant 0 : i32
    %c0_i32_1 = arith.constant 0 : i32
    return %c0_i32, %c0_i32_0 : i32, i32
  }
  func.func @transform_3(%arg0: i32) -> (i32, i32) {
    %c0_i32 = arith.constant 0 : i32
    %c0_i32_0 = arith.constant 0 : i32
    %c0_i32_1 = arith.constant 0 : i32
    return %c0_i32, %c0_i32_0 : i32, i32
  }
  func.func @transform_4(%arg0: i32) -> (i32, i32) {
    %c0_i32 = arith.constant 0 : i32
    %c0_i32_0 = arith.constant 0 : i32
    %c0_i32_1 = arith.constant 0 : i32
    return %c0_i32, %c0_i32_0 : i32, i32
  }
  func.func @transform_5(%arg0: i32) -> (i32, i32) {
    %c0_i32 = arith.constant 0 : i32
    %c0_i32_0 = arith.constant 0 : i32
    %c0_i32_1 = arith.constant 0 : i32
    return %c0_i32, %c0_i32_0 : i32, i32
  }
  func.func @transform_6(%arg0: i32) -> (i32, i32) {
    %c0_i32 = arith.constant 0 : i32
    %c0_i32_0 = arith.constant 0 : i32
    %c0_i32_1 = arith.constant 0 : i32
    return %c0_i32, %c0_i32_0 : i32, i32
  }
  func.func @transform_7(%arg0: i32) -> (i32, i32, i32) {
    %c0_i32 = arith.constant 0 : i32
    %c0_i32_0 = arith.constant 0 : i32
    %c0_i32_1 = arith.constant 0 : i32
    %c0_i32_2 = arith.constant 0 : i32
    return %c0_i32, %c0_i32_0, %c0_i32_1 : i32, i32, i32
  }
  func.func @transform_8(%arg0: i32) -> (i32, i32, i32) {
    %c0_i32 = arith.constant 0 : i32
    %c0_i32_0 = arith.constant 0 : i32
    %c0_i32_1 = arith.constant 0 : i32
    %c0_i32_2 = arith.constant 0 : i32
    return %c0_i32, %c0_i32_0, %c0_i32_1 : i32, i32, i32
  }
  func.func @transform_9(%arg0: i32) -> (i32, i32) {
    %c0_i32 = arith.constant 0 : i32
    %c0_i32_0 = arith.constant 0 : i32
    %c0_i32_1 = arith.constant 0 : i32
    return %c0_i32, %c0_i32_0 : i32, i32
  }
  func.func @transform_10(%arg0: i32) -> (i32, i32) {
    %c0_i32 = arith.constant 0 : i32
    %c0_i32_0 = arith.constant 0 : i32
    %c0_i32_1 = arith.constant 0 : i32
    return %c0_i32, %c0_i32_0 : i32, i32
  }
  func.func @transform_11(%arg0: i32) -> (i32, i32) {
    %c0_i32 = arith.constant 0 : i32
    %c0_i32_0 = arith.constant 0 : i32
    return %arg0, %c0_i32 : i32, i32
  }
}

</mosaic_0001>

<bundles_post_ra>
// kernel: tpu_custom_call.1
= control target key start
LH: loop header
LB: loop body
LE: loop exit
PB: predicated region body
PF: predicated region fallthrough
CT: control target
= control target key end

     0   :  { %16 = vsyncpa [#allocation3], 0  ;;  %s1963_s0 = inlined_call_operand.vmem [shape: s32[16,8], index: 0, kind: input, shape index: {}]   ;;  %s1964_s1 = inlined_call_operand.hbm [shape: f32[8,512], index: 1, kind: input, shape index: {}]   ;;  %s1965_s2 = inlined_call_operand.vmem [shape: f32[1,512], index: 2, kind: input, shape index: {}]   ;;  %s1966_s3 = inlined_call_operand.hbm [shape: f32[512,128], index: 3, kind: input, shape index: {}]   ;;  %s1967_s4 = inlined_call_operand.hbm [shape: f32[128,1024], index: 4, kind: input, shape index: {}]   ;;  %s1968_s5 = inlined_call_operand.vmem [shape: f32[1,1024], index: 5, kind: input, shape index: {}]   ;;  %s1969_s6 = inlined_call_operand.vmem [shape: f32[1,128], index: 6, kind: input, shape index: {}]   ;;  %s1970_s7 = inlined_call_operand.hbm [shape: f32[2,128,256], index: 7, kind: input, shape index: {}]   ;;  %s1971_s8 = inlined_call_operand.vmem [shape: f32[2,1,256], index: 8, kind: input, shape index: {}]   ;;  %s1972_s9 = inlined_call_operand.hbm [shape: f32[128,128], index: 9, kind: input, shape index: {}]   ;;  %s1973_s10 = inlined_call_operand.vmem [shape: f32[1,128], index: 10, kind: input, shape index: {}]   ;;  %s1974_s11 = inlined_call_operand.hbm [shape: f32[16,128], index: 11, kind: output, shape index: {}]  }
   0x1   :  { %17 = vsyncpa [#allocation6], 0 }
   0x2   :  { %18 = vsyncpa [#allocation9], 0 }
   0x3   :  { %19 = vsyncpa [#allocation4], 0  ;;  %s1754_s17 = smov [#allocation5]  }
   0x4   :  { %s39_s18 = sshll.u32 %s1754_s17, 4  ;;  %s40_s18 = int_to_ptr.vmem [resolvable:$true] %s39_s18 }
   0x5   :  { %s1634_s19 = scalar_lea.vmem %s40_s18, 8192  ;;  %p1639_p1 = scmp.lt.s32.totalorder %s40_s18, %s40_s18 }
   0x6   :  { %p1635_p0 = scmp.ne.s32.totalorder %s40_s18, %s1634_s19  ;;  %p1640_p2 = scmp.lt.s32.totalorder %s1634_s19, %s1634_s19 }
   0x8   :  { %p1641_p3 = por %p1640_p2, %p1639_p1 }
   0xa   :  { %p1642_p4 = pnand %p1641_p3, %p1635_p0 }
   0xc   :  { %1645 = shalt.err (!%p1642_p4)
}
   0xd   :  { %s1755_s20 = smov 128   ;;  %s1756_s21 = smov 8  }
   0xe   :  { %45 = dma.hbm_to_vmem [thread:$0]  %s1966_s3, 8192, %s40_s18, [#allocation6], %s1755_s20, %s1755_s20, %s1756_s21  }
   0xf   :  { %s1757_s24 = smov [#allocation8]  }
  0x10   :  { %s67_s25 = sshll.u32 %s1757_s24, 4  ;;  %s68_s25 = int_to_ptr.vmem [resolvable:$true] %s67_s25 }
  0x11   :  { %s1654_s26 = scalar_lea.vmem %s68_s25, 8192  ;;  %p1659_p6 = scmp.lt.s32.totalorder %s68_s25, %s68_s25 }
  0x12   :  { %p1655_p5 = scmp.ne.s32.totalorder %s68_s25, %s1654_s26  ;;  %p1660_p7 = scmp.lt.s32.totalorder %s1654_s26, %s1654_s26 }
  0x14   :  { %p1661_p8 = por %p1660_p7, %p1659_p6 }
  0x16   :  { %p1662_p9 = pnand %p1661_p8, %p1655_p5 }
  0x18   :  { %1665 = shalt.err (!%p1662_p9)
}
  0x19   :  { %s1758_s27 = smov 256   ;;  %s1759_s28 = smov 16  }
  0x1a   :  { %73 = dma.hbm_to_vmem [thread:$0]  %s1970_s7, 8192, %s68_s25, [#allocation9], %s1758_s27, %s1758_s27, %s1759_s28  }
  0x1b   :  { %s1760_s12 = smov [#allocation2]   ;;  %s1761_s14 = smov [#allocation7]  }
  0x1c   :  { %s28_s13 = sshll.u32 %s1760_s12, 4  ;;  %s51_s3 = sshll.u32 %s1761_s14, 4  ;;  %s29_s13 = int_to_ptr.vmem [resolvable:$true] %s28_s13  ;;  %s52_s3 = int_to_ptr.vmem [resolvable:$true] %s51_s3 }
  0x1d   :  { %s1674_s15 = scalar_lea.vmem %s29_s13, 512  ;;  %p1679_p11 = scmp.lt.s32.totalorder %s29_s13, %s29_s13 }
  0x1e   :  { %p1675_p10 = scmp.ne.s32.totalorder %s29_s13, %s1674_s15  ;;  %p1680_p12 = scmp.lt.s32.totalorder %s1674_s15, %s1674_s15 }
  0x20   :  { %p1681_p13 = por %p1680_p12, %p1679_p11 }
  0x22   :  { %p1682_p0 = pnand %p1681_p13, %p1675_p10 }
  0x24   :  { %1685 = shalt.err (!%p1682_p0)
}
  0x25   :  { %31 = dma.hbm_to_vmem [thread:$0]  %s1964_s1, 512, %s29_s13, [#allocation3]  }
  0x26   :  { %s1694_s18 = scalar_lea.vmem %s52_s3, 16384  ;;  %p1699_p2 = scmp.lt.s32.totalorder %s52_s3, %s52_s3 }
  0x27   :  { %p1695_p1 = scmp.ne.s32.totalorder %s52_s3, %s1694_s18  ;;  %p1700_p3 = scmp.lt.s32.totalorder %s1694_s18, %s1694_s18 }
  0x29   :  { %p1701_p4 = por %p1700_p3, %p1699_p2 }
  0x2b   :  { %p1702_p5 = pnand %p1701_p4, %p1695_p1 }
  0x2d   :  { %1705 = shalt.err (!%p1702_p5)
}
  0x2e   :  { %s1762_s7 = smov 1024   ;;  %s1763_s19 = smov 64  }
  0x2f   :  { %57 = dma.hbm_to_vmem [thread:$0]  %s1967_s4, 16384, %s52_s3, [#allocation6], %s1762_s7, %s1762_s7, %s1763_s19  }
  0x30   :  { %s1764_s24 = smov [#allocation10]  }
  0x31   :  { %s81_s25 = sshll.u32 %s1764_s24, 4  ;;  %s82_s25 = int_to_ptr.vmem [resolvable:$true] %s81_s25 }
  0x32   :  { %s1714_s26 = scalar_lea.vmem %s82_s25, 2048  ;;  %p1719_p7 = scmp.lt.s32.totalorder %s82_s25, %s82_s25 }
  0x33   :  { %p1715_p6 = scmp.ne.s32.totalorder %s82_s25, %s1714_s26  ;;  %p1720_p8 = scmp.lt.s32.totalorder %s1714_s26, %s1714_s26 }
  0x35   :  { %p1721_p9 = por %p1720_p8, %p1719_p7 }
  0x37   :  { %p1722_p10 = pnand %p1721_p9, %p1715_p6 }
  0x39   :  { %1725 = shalt.err (!%p1722_p10)
}
  0x3a   :  { %87 = dma.hbm_to_vmem [thread:$0]  %s1972_s9, 2048, %s82_s25, [#allocation9], %s1755_s20, %s1755_s20, %s1756_s21  }
  0x3b   :  { %1746 = dma.done.wait [#allocation3], 512  }
  0x3c   :  { %1747 = vsyncadd [#allocation3], 4294966784 }
  0x3d   :  { %1748 = dma.done.wait [#allocation6], 24576  }
  0x3e   :  { %1749 = vsyncadd [#allocation6], 4294942720 }
  0x3f   :  { %1750 = dma.done.wait [#allocation9], 10240  }
  0x40   :  { %1751 = vsyncadd [#allocation9], 4294957056  ;;  %v1765_v0 = vmov 0.0   ;;  %v110_v1 = vld [vmem:[#allocation2 + $0x8] sm:$0xff]  ;;  %v109_v2 = vld [vmem:[#allocation2] sm:$0xff]  ;;  %vm113_vm0 = vcmask 64512  }
  0x41   :  { %184 = vmatprep.mubr.f32.mxu1 %v1765_v0  ;;  %v105_v3 = vld [vmem:[%s1963_s0] sm:$0xff]  ;;  %150 = vmatprep.subr.mxu1 %v110_v1  ;;  %v112_v5 = vld [vmem:[#allocation2 + $0x18] sm:$0xff]  ;;  %v111_v6 = vld [vmem:[#allocation2 + $0x10] sm:$0xff]  ;;  %s1767_s17 = smov [#allocation11]  }
  0x42   :  { %v107_v4 = vcvt.s32.f32 %v105_v3  ;;  %v106_v7 = vld [vmem:[%s1963_s0 + $0x8] sm:$0xff]  ;;  %151 = vmatpush1.msra.mxu1 %v109_v2  ;;  %v351_v8 = vld [vmem:[#allocation5 + $0xf8] sm:$0xff]  ;;  %v350_v11 = vld [vmem:[#allocation5 + $0xf0] sm:$0xff]  ;;  %s1426_s18 = sshll.u32 %s1767_s17, 4  ;;  %s1427_s18 = int_to_ptr.vmem [resolvable:$true] %s1426_s18 }
  0x43   :  { %227 = vmatprep.subr.mxu1 %v112_v5  ;;  %v108_v9 = vcvt.s32.f32 %v106_v7  ;;  %v335_v10 = vld [vmem:[#allocation5 + $0x78] sm:$0xff]  ;;  %1467 = vmatprep.subr.mxu0 %v351_v8  ;;  %v334_v12 = vld [vmem:[#allocation5 + $0x70] sm:$0xff]  ;;  %v349_v14 = vld [vmem:[#allocation5 + $0xe8] sm:$0xff]  ;;  %s1726_s7 = scalar_lea.vmem %s1427_s18, 256  ;;  %p1731_p12 = scmp.lt.s32.totalorder %s1427_s18, %s1427_s18 }
  0x44   :  { %1440 = vmatmul.mubr.msk.f32.vlgmr.msra.gmra.mxu1 %vm113_vm0, %v107_v4  ;;  %v383_v13 = vld [vmem:[#allocation5 + $0x1f8] sm:$0xff]  ;;  %1468 = vmatpush3.msra.mxu0 %v335_v10  ;;  %v333_v15 = vld [vmem:[#allocation5 + $0x68] sm:$0xff]  ;;  %v348_v16 = vld [vmem:[#allocation5 + $0xe0] sm:$0xff]  ;;  %p1727_p11 = scmp.ne.s32.totalorder %s1427_s18, %s1726_s7  ;;  %p1732_p13 = scmp.lt.s32.totalorder %s1726_s7, %s1726_s7 }
  0x45   :  { %228 = vmatpush1.msra.mxu1 %v111_v6  ;;  %190 = vmatprep.mubr.f32.mxu1 %v1765_v0  ;;  %v332_v17 = vld [vmem:[#allocation5 + $0x60] sm:$0xff]  ;;  %v347_v18 = vld [vmem:[#allocation5 + $0xd8] sm:$0xff]  ;;  %v382_v21 = vld [vmem:[#allocation5 + $0x1f0] sm:$0xff] }
  0x46   :  { %1505 = vmatprep.subr.mxu1 %v383_v13  ;;  %1469 = vmatprep.subr.mxu0 %v350_v11  ;;  %v367_v19 = vld [vmem:[#allocation5 + $0x178] sm:$0xff]  ;;  %v346_v22 = vld [vmem:[#allocation5 + $0xd0] sm:$0xff]  ;;  %v345_v25 = vld [vmem:[#allocation5 + $0xc8] sm:$0xff]  ;;  %p1733_p0 = por %p1732_p13, %p1731_p12 }
  0x47   :  { %1470 = vmatpush3.msra.mxu0 %v334_v12  ;;  %v331_v20 = vld [vmem:[#allocation5 + $0x58] sm:$0xff]  ;;  %v330_v23 = vld [vmem:[#allocation5 + $0x50] sm:$0xff]  ;;  %v381_v26 = vld [vmem:[#allocation5 + $0x1e8] sm:$0xff]  ;;  %v276_v12 = vlaneseq }
  0x48   :  { %1441 = vmatmul.mubr.msk.f32.gmra.mxu1 %vm113_vm0, %v108_v9  ;;  %1471 = vmatprep.subr.mxu0 %v349_v14  ;;  %v366_v24 = vld [vmem:[#allocation5 + $0x170] sm:$0xff]  ;;  %v329_v27 = vld [vmem:[#allocation5 + $0x48] sm:$0xff]  ;;  %v344_v29 = vld [vmem:[#allocation5 + $0xc0] sm:$0xff]  ;;  %p1734_p1 = pnand %p1733_p0, %p1727_p11 }
  0x49   :  { %261 = vmatprep.mubr.f32.mxu1 %v1765_v0  ;;  %1472 = vmatpush3.msra.mxu0 %v333_v15  ;;  %v365_v28 = vld [vmem:[#allocation5 + $0x168] sm:$0xff]  ;;  %v380_v30 = vld [vmem:[#allocation5 + $0x1e0] sm:$0xff]  ;;  %v343_v33 = vld [vmem:[#allocation5 + $0xb8] sm:$0xff]  ;;  %v1863_v13 = vshrl.u32 %v276_v12, 7 }
  0x4a   :  { %1473 = vmatprep.subr.mxu0 %v348_v16  ;;  %v328_v31 = vld [vmem:[#allocation5 + $0x40] sm:$0xff]  ;;  %v379_v34 = vld [vmem:[#allocation5 + $0x1d8] sm:$0xff]  ;;  %v342_v37 = vld [vmem:[#allocation5 + $0xb0] sm:$0xff] }
  0x4b   :  { %1474 = vmatpush3.msra.mxu0 %v332_v17  ;;  %v364_v32 = vld [vmem:[#allocation5 + $0x160] sm:$0xff]  ;;  %v327_v35 = vld [vmem:[#allocation5 + $0x38] sm:$0xff]  ;;  %v378_v38 = vld [vmem:[#allocation5 + $0x1d0] sm:$0xff]  ;;  %v1866_v14 = vsub.s32 1, %v1863_v13  ;;  %v1869_v15 = vsub.s32 0, %v1863_v13 }
  0x4c   :  { %1442 = vmatmul.mubr.msk.f32.vlgmr.msra.gmra.mxu1 %vm113_vm0, %v107_v4  ;;  %1475 = vmatprep.subr.mxu0 %v347_v18  ;;  %v363_v36 = vld [vmem:[#allocation5 + $0x158] sm:$0xff]  ;;  %v326_v39 = vld [vmem:[#allocation5 + $0x30] sm:$0xff]  ;;  %v341_v41 = vld [vmem:[#allocation5 + $0xa8] sm:$0xff] }
  0x4d   :  { %267 = vmatprep.mubr.f32.mxu1 %v1765_v0  ;;  %1506 = vmatpush3.msra.mxu1 %v367_v19  ;;  %v362_v40 = vld [vmem:[#allocation5 + $0x150] sm:$0xff]  ;;  %v377_v42 = vld [vmem:[#allocation5 + $0x1c8] sm:$0xff]  ;;  %v340_v45 = vld [vmem:[#allocation5 + $0xa0] sm:$0xff] }
  0x4e   :  { %1476 = vmatpush3.msra.mxu0 %v331_v20  ;;  %1507 = vmatprep.subr.mxu1 %v382_v21  ;;  %v325_v43 = vld [vmem:[#allocation5 + $0x28] sm:$0xff]  ;;  %v376_v46 = vld [vmem:[#allocation5 + $0x1c0] sm:$0xff]  ;;  %v339_v49 = vld [vmem:[#allocation5 + $0x98] sm:$0xff]  ;;  %v290_v21 = vsub.s32 3, %v1863_v13 }
  0x4f   :  { %1477 = vmatprep.subr.mxu0 %v346_v22  ;;  %1508 = vmatpush3.msra.mxu1 %v366_v24  ;;  %v361_v44 = vld [vmem:[#allocation5 + $0x148] sm:$0xff]  ;;  %v324_v47 = vld [vmem:[#allocation5 + $0x20] sm:$0xff]  ;;  %v375_v50 = vld [vmem:[#allocation5 + $0x1b8] sm:$0xff]  ;;  %v1766_v24 = vmov 1.0  }
  0x50   :  { %1443 = vmatmul.mubr.msk.f32.gmra.mxu1 %vm113_vm0, %v108_v9  ;;  %1478 = vmatpush3.msra.mxu0 %v330_v23  ;;  %v360_v48 = vld [vmem:[#allocation5 + $0x140] sm:$0xff]  ;;  %v323_v51 = vld [vmem:[#allocation5 + $0x18] sm:$0xff]  ;;  %v338_v53 = vld [vmem:[#allocation5 + $0x90] sm:$0xff] }
  0x51   :  { %1479 = vmatprep.subr.mxu0 %v345_v25  ;;  %1509 = vmatprep.subr.mxu1 %v381_v26  ;;  %v359_v52 = vld [vmem:[#allocation5 + $0x138] sm:$0xff]  ;;  %v374_v54 = vld [vmem:[#allocation5 + $0x1b0] sm:$0xff]  ;;  %v337_v57 = vld [vmem:[#allocation5 + $0x88] sm:$0xff]  ;;  %v286_v25 = vsub.s32 2, %v1863_v13 }
  0x52   :  { %1480 = vmatpush3.msra.mxu0 %v329_v27  ;;  %1510 = vmatpush3.msra.mxu1 %v365_v28  ;;  %v322_v55 = vld [vmem:[#allocation5 + $0x10] sm:$0xff]  ;;  %v373_v58 = vld [vmem:[#allocation5 + $0x1a8] sm:$0xff]  ;;  %v336_v61 = vld [vmem:[#allocation5 + $0x80] sm:$0xff] }
  0x53   :  { %1481 = vmatprep.subr.mxu0 %v344_v29  ;;  %1511 = vmatprep.subr.mxu1 %v380_v30  ;;  %v358_v56 = vld [vmem:[#allocation5 + $0x130] sm:$0xff]  ;;  %v321_v59 = vld [vmem:[#allocation5 + $0x8] sm:$0xff]  ;;  %v372_v62 = vld [vmem:[#allocation5 + $0x1a0] sm:$0xff] }
  0x54   :  { %1482 = vmatpush3.msra.mxu0 %v328_v31  ;;  %1512 = vmatpush3.msra.mxu1 %v364_v32  ;;  %v357_v60 = vld [vmem:[#allocation5 + $0x128] sm:$0xff]  ;;  %v320_v63 = vld [vmem:[#allocation5] sm:$0xff]  ;;  %v371_v2 = vld [vmem:[#allocation5 + $0x198] sm:$0xff] }
  0x55   :  { %1483 = vmatprep.subr.mxu0 %v343_v33  ;;  %1513 = vmatprep.subr.mxu1 %v379_v34  ;;  %v356_v1 = vld [vmem:[#allocation5 + $0x120] sm:$0xff]  ;;  %v355_v3 = vld [vmem:[#allocation5 + $0x118] sm:$0xff]  ;;  %v370_v4 = vld [vmem:[#allocation5 + $0x190] sm:$0xff] }
  0x56   :  { %1484 = vmatpush3.msra.mxu0 %v327_v35  ;;  %1514 = vmatpush3.msra.mxu1 %v363_v36  ;;  %v354_v5 = vld [vmem:[#allocation5 + $0x110] sm:$0xff]  ;;  %v369_v6 = vld [vmem:[#allocation5 + $0x188] sm:$0xff]  ;;  %v368_v8 = vld [vmem:[#allocation5 + $0x180] sm:$0xff] }
  0x57   :  { %1485 = vmatprep.subr.mxu0 %v342_v37  ;;  %1515 = vmatprep.subr.mxu1 %v378_v38  ;;  %v353_v7 = vld [vmem:[#allocation5 + $0x108] sm:$0xff]  ;;  %v352_v9 = vld [vmem:[#allocation5 + $0x100] sm:$0xff]  ;;  %v657_v11 = vld [vmem:[#allocation7 + $0x3d8] sm:$0xff] }
  0x58   :  { %1486 = vmatpush3.msra.mxu0 %v326_v39  ;;  %1516 = vmatpush3.msra.mxu1 %v362_v40  ;;  %v655_v10 = vld [vmem:[#allocation7 + $0x3c8] sm:$0xff]  ;;  %v274_v16 = vld [vmem:[%s1965_s2] sm:$0xf]  ;;  %v656_v38 = vld [vmem:[#allocation7 + $0x3d0] sm:$0xff] }
  0x59   :  { %1487 = vmatprep.subr.mxu0 %v341_v41  ;;  %1517 = vmatprep.subr.mxu1 %v377_v42  ;;  %v283_v17 = vrot.slane %v274_v16, %v1866_v14  ;;  %v279_v19 = vrot.slane %v274_v16, %v1869_v15  ;;  %v654_v22 = vld [vmem:[#allocation7 + $0x3c0] sm:$0xff]  ;;  %v647_v26 = vld [vmem:[#allocation7 + $0x388] sm:$0xff]  ;;  %v291_v30 = vrot.slane %v274_v16, %v290_v21  ;;  %v649_v41 = vld [vmem:[#allocation7 + $0x398] sm:$0xff] }
  0x5a   :  { %1488 = vmatpush3.msra.mxu0 %v325_v43  ;;  %1518 = vmatpush3.msra.mxu1 %v361_v44  ;;  %v646_v27 = vld [vmem:[#allocation7 + $0x380] sm:$0xff]  ;;  %v639_v29 = vld [vmem:[#allocation7 + $0x348] sm:$0xff]  ;;  %v287_v33 = vrot.slane %v274_v16, %v286_v25  ;;  %v648_v43 = vld [vmem:[#allocation7 + $0x390] sm:$0xff] }
  0x5b   :  { %1489 = vmatprep.subr.mxu0 %v340_v45  ;;  %1519 = vmatprep.subr.mxu1 %v376_v46  ;;  %v638_v31 = vld [vmem:[#allocation7 + $0x340] sm:$0xff]  ;;  %v631_v34 = vld [vmem:[#allocation7 + $0x308] sm:$0xff]  ;;  %v641_v45 = vld [vmem:[#allocation7 + $0x358] sm:$0xff] }
  0x5c   :  { %1490 = vmatpush3.msra.mxu0 %v324_v47  ;;  %1520 = vmatpush3.msra.mxu1 %v360_v48  ;;  %v630_v35 = vld [vmem:[#allocation7 + $0x300] sm:$0xff]  ;;  %v623_v37 = vld [vmem:[#allocation7 + $0x2c8] sm:$0xff]  ;;  %v640_v46 = vld [vmem:[#allocation7 + $0x350] sm:$0xff] }
  0x5d   :  { %1491 = vmatprep.subr.mxu0 %v339_v49  ;;  %1521 = vmatprep.subr.mxu1 %v375_v50  ;;  %v622_v39 = vld [vmem:[#allocation7 + $0x2c0] sm:$0xff]  ;;  %v615_v42 = vld [vmem:[#allocation7 + $0x288] sm:$0xff]  ;;  %v633_v48 = vld [vmem:[#allocation7 + $0x318] sm:$0xff] }
  0x5e   :  { %1492 = vmatpush3.msra.mxu0 %v323_v51  ;;  %1522 = vmatpush3.msra.mxu1 %v359_v52  ;;  %v614_v47 = vld [vmem:[#allocation7 + $0x280] sm:$0xff]  ;;  %v607_v49 = vld [vmem:[#allocation7 + $0x248] sm:$0xff]  ;;  %v632_v50 = vld [vmem:[#allocation7 + $0x310] sm:$0xff] }
  0x5f   :  { %1493 = vmatprep.subr.mxu0 %v338_v53  ;;  %1523 = vmatprep.subr.mxu1 %v374_v54  ;;  %v606_v51 = vld [vmem:[#allocation7 + $0x240] sm:$0xff]  ;;  %v625_v52 = vld [vmem:[#allocation7 + $0x2d8] sm:$0xff]  ;;  %v599_v53 = vld [vmem:[#allocation7 + $0x208] sm:$0xff] }
  0x60   :  { %1494 = vmatpush3.msra.mxu0 %v322_v55  ;;  %1524 = vmatpush3.msra.mxu1 %v358_v56  ;;  %v624_v54 = vld [vmem:[#allocation7 + $0x2d0] sm:$0xff]  ;;  %v598_v55 = vld [vmem:[#allocation7 + $0x200] sm:$0xff]  ;;  %v617_v56 = vld [vmem:[#allocation7 + $0x298] sm:$0xff] }
  0x61   :  { %1495 = vmatprep.subr.mxu0 %v337_v57  ;;  %1525 = vmatprep.subr.mxu1 %v373_v58  ;;  %v591_v57 = vld [vmem:[#allocation7 + $0x1c8] sm:$0xff]  ;;  %v616_v58 = vld [vmem:[#allocation7 + $0x290] sm:$0xff]  ;;  %v569_v12 = vld [vmem:[#allocation7 + $0x118] sm:$0xff] }
  0x62   :  { %1496 = vmatpush3.msra.mxu0 %v321_v59  ;;  %1526 = vmatpush3.msra.mxu1 %v357_v60  ;;  %v590_v59 = vld [vmem:[#allocation7 + $0x1c0] sm:$0xff]  ;;  %v609_v60 = vld [vmem:[#allocation7 + $0x258] sm:$0xff] }
  0x63   :  { %1497 = vmatprep.subr.mxu0 %v336_v61  ;;  %1527 = vmatprep.subr.mxu1 %v372_v62  ;;  %v608_v61 = vld [vmem:[#allocation7 + $0x250] sm:$0xff]  ;;  %v601_v62 = vld [vmem:[#allocation7 + $0x218] sm:$0xff]  ;;  %v566_v16 = vld [vmem:[#allocation7 + $0x100] sm:$0xff] }
  0x64   :  { %1498 = vmatpush3.msra.mxu0 %v320_v63  ;;  %1528 = vmatpush3.msra.mxu1 %v356_v1  ;;  %v600_v63 = vld [vmem:[#allocation7 + $0x210] sm:$0xff]  ;;  %v593_v1 = vld [vmem:[#allocation7 + $0x1d8] sm:$0xff] }
  0x65   :  { %1529 = vmatprep.subr.mxu1 %v371_v2  ;;  %704 = vmatprep.subr.mxu0 %v655_v10  ;;  %v592_v2 = vld [vmem:[#allocation7 + $0x1d0] sm:$0xff] }
  0x66   :  { %1530 = vmatpush3.msra.mxu1 %v355_v3  ;;  %v583_v3 = vld [vmem:[#allocation7 + $0x188] sm:$0xff]  ;;  %v576_v10 = vld [vmem:[#allocation7 + $0x150] sm:$0xff] }
  0x67   :  { %1531 = vmatprep.subr.mxu1 %v370_v4  ;;  %v585_v4 = vld [vmem:[#allocation7 + $0x198] sm:$0xff] }
  0x68   :  { %1532 = vmatpush3.msra.mxu1 %v354_v5  ;;  %v582_v5 = vld [vmem:[#allocation7 + $0x180] sm:$0xff] }
  0x69   :  { %1533 = vmatprep.subr.mxu1 %v369_v6  ;;  %v584_v6 = vld [vmem:[#allocation7 + $0x190] sm:$0xff] }
  0x6a   :  { %1534 = vmatpush3.msra.mxu1 %v353_v7  ;;  %v575_v7 = vld [vmem:[#allocation7 + $0x148] sm:$0xff] }
  0x6b   :  { %1535 = vmatprep.subr.mxu1 %v368_v8  ;;  %v577_v8 = vld [vmem:[#allocation7 + $0x158] sm:$0xff] }
  0x6c   :  { %1536 = vmatpush3.msra.mxu1 %v352_v9  ;;  %v574_v9 = vld [vmem:[#allocation7 + $0x140] sm:$0xff] }
  0x6d   :  { %781 = vmatprep.subr.mxu1 %v657_v11  ;;  %v567_v11 = vld [vmem:[#allocation7 + $0x108] sm:$0xff] }
 0x104   :  { %v186_v18 = vpop.f32.mrf.mxu1 }
 0x105   :  { %vm296_vm2 = vcmp.eq.f32.partialorder %v186_v18, %v279_v19  ;;  %v559_v18 = vld [vmem:[#allocation7 + $0xc8] sm:$0xff] }
 0x106   :  { %v188_v20 = vpop.f32.mrf.mxu1 }
 0x107   :  { %vm297_vm1 = vcmp.eq.f32.partialorder %v188_v20, %v283_v17  ;;  %v558_v20 = vld [vmem:[#allocation7 + $0xc0] sm:$0xff] }
 0x108   :  { %v192_v23 = vpop.f32.mrf.mxu1  ;;  %1452 = vmatprep.mubr.msk.f32.mxu0 %vm297_vm1, %v1766_v24 }
 0x109   :  { %1453 = vmatmul.mubr.msk.f32.vlgmr.msra.gmra.mxu0 %vm296_vm2, %v1766_v24  ;;  %vm300_vm4 = vcmp.eq.f32.partialorder %v192_v23, %v279_v19  ;;  %v561_v19 = vld [vmem:[#allocation7 + $0xd8] sm:$0xff]  ;;  %v551_v23 = vld [vmem:[#allocation7 + $0x88] sm:$0xff] }
 0x10a   :  { %v194_v28 = vpop.f32.mrf.mxu1  ;;  %705 = vmatpush1.msra.mxu0 %v654_v22  ;;  %v560_v22 = vld [vmem:[#allocation7 + $0xd0] sm:$0xff] }
 0x10b   :  { %vm301_vm3 = vcmp.eq.f32.partialorder %v194_v28, %v283_v17  ;;  %706 = vmatprep.subr.mxu0 %v647_v26  ;;  %v568_v17 = vld [vmem:[#allocation7 + $0x110] sm:$0xff]  ;;  %v550_v26 = vld [vmem:[#allocation7 + $0x80] sm:$0xff]  ;;  %v543_v28 = vld [vmem:[#allocation7 + $0x48] sm:$0xff] }
 0x10c   :  { %v263_v32 = vpop.f32.mrf.mxu1  ;;  %1454 = vmatprep.mubr.msk.f32.mxu0 %vm301_vm3, %v1766_v24  ;;  %707 = vmatpush1.msra.mxu0 %v646_v27  ;;  %v552_v27 = vld [vmem:[#allocation7 + $0x90] sm:$0xff] }
 0x10d   :  { %1455 = vmatmul.mubr.msk.f32.gmra.mxu0 %vm300_vm4, %v1766_v24  ;;  %708 = vmatprep.subr.mxu0 %v639_v29  ;;  %vm298_vm6 = vcmp.eq.f32.partialorder %v263_v32, %v287_v33  ;;  %v545_v29 = vld [vmem:[#allocation7 + $0x58] sm:$0xff]  ;;  %v535_v32 = vld [vmem:[#allocation7 + $0x8] sm:$0xff] }
 0x10e   :  { %v265_v36 = vpop.f32.mrf.mxu1  ;;  %709 = vmatpush1.msra.mxu0 %v638_v31  ;;  %768 = vmatprep.mubr.f32.mxu0 %v1765_v0  ;;  %v544_v31 = vld [vmem:[#allocation7 + $0x50] sm:$0xff] }
 0x10f   :  { %vm299_vm5 = vcmp.eq.f32.partialorder %v265_v36, %v291_v30  ;;  %710 = vmatprep.subr.mxu0 %v631_v34  ;;  %v534_v34 = vld [vmem:[#allocation7] sm:$0xff]  ;;  %v659_v36 = vld [vmem:[#allocation7 + $0x3e8] sm:$0xff] }
 0x110   :  { %v269_v40 = vpop.f32.mrf.mxu1  ;;  %1456 = vmatprep.mubr.msk.f32.mxu1 %vm299_vm5, %v1766_v24  ;;  %711 = vmatpush1.msra.mxu0 %v630_v35  ;;  %v536_v35 = vld [vmem:[#allocation7 + $0x10] sm:$0xff] }
 0x111   :  { %1457 = vmatmul.mubr.msk.f32.vlgmr.msra.gmra.mxu1 %vm298_vm6, %v1766_v24  ;;  %712 = vmatprep.subr.mxu0 %v623_v37  ;;  %vm302_vm7 = vcmp.eq.f32.partialorder %v269_v40, %v287_v33  ;;  %v537_v33 = vld [vmem:[#allocation7 + $0x18] sm:$0xff] }
 0x112   :  { %v271_v44 = vpop.f32.mrf.mxu1  ;;  %782 = vmatpush1.msra.mxu1 %v656_v38  ;;  %713 = vmatpush1.msra.mxu0 %v622_v39  ;;  %v661_v37 = vld [vmem:[#allocation7 + $0x3f8] sm:$0xff] }
 0x113   :  { %vm303_vm8 = vcmp.eq.f32.partialorder %v271_v44, %v291_v30  ;;  %783 = vmatprep.subr.mxu1 %v649_v41  ;;  %714 = vmatprep.subr.mxu0 %v615_v42  ;;  %v542_v30 = vld [vmem:[#allocation7 + $0x40] sm:$0xff] }
 0x114   :  { %1458 = vmatprep.mubr.msk.f32.mxu1 %vm303_vm8, %v1766_v24  ;;  %784 = vmatpush1.msra.mxu1 %v648_v43 }
 0x115   :  { %1459 = vmatmul.mubr.msk.f32.gmra.mxu1 %vm302_vm7, %v1766_v24  ;;  %785 = vmatprep.subr.mxu1 %v641_v45  ;;  %v553_v24 = vld [vmem:[#allocation7 + $0x98] sm:$0xff] }
 0x116   :  { %786 = vmatpush1.msra.mxu1 %v640_v46  ;;  %715 = vmatpush1.msra.mxu0 %v614_v47 }
 0x117   :  { %787 = vmatprep.subr.mxu1 %v633_v48  ;;  %716 = vmatprep.subr.mxu0 %v607_v49  ;;  %v658_v48 = vld [vmem:[#allocation7 + $0x3e0] sm:$0xff]  ;;  %v660_v49 = vld [vmem:[#allocation7 + $0x3f0] sm:$0xff] }
 0x118   :  { %788 = vmatpush1.msra.mxu1 %v632_v50  ;;  %717 = vmatpush1.msra.mxu0 %v606_v51  ;;  %v651_v51 = vld [vmem:[#allocation7 + $0x3a8] sm:$0xff] }
 0x119   :  { %789 = vmatprep.subr.mxu1 %v625_v52  ;;  %718 = vmatprep.subr.mxu0 %v599_v53  ;;  %v653_v52 = vld [vmem:[#allocation7 + $0x3b8] sm:$0xff] }
 0x11a   :  { %790 = vmatpush1.msra.mxu1 %v624_v54  ;;  %719 = vmatpush1.msra.mxu0 %v598_v55  ;;  %v650_v55 = vld [vmem:[#allocation7 + $0x3a0] sm:$0xff] }
 0x11b   :  { %791 = vmatprep.subr.mxu1 %v617_v56  ;;  %720 = vmatprep.subr.mxu0 %v591_v57  ;;  %v652_v56 = vld [vmem:[#allocation7 + $0x3b0] sm:$0xff] }
 0x11c   :  { %792 = vmatpush1.msra.mxu1 %v616_v58  ;;  %721 = vmatpush1.msra.mxu0 %v590_v59  ;;  %v643_v58 = vld [vmem:[#allocation7 + $0x368] sm:$0xff]  ;;  %v645_v59 = vld [vmem:[#allocation7 + $0x378] sm:$0xff] }
 0x11d   :  { %793 = vmatprep.subr.mxu1 %v609_v60  ;;  %845 = vmatprep.mubr.f32.mxu1 %v1765_v0  ;;  %v642_v60 = vld [vmem:[#allocation7 + $0x360] sm:$0xff] }
 0x11e   :  { %794 = vmatpush1.msra.mxu1 %v608_v61  ;;  %722 = vmatprep.subr.mxu0 %v583_v3  ;;  %v644_v61 = vld [vmem:[#allocation7 + $0x370] sm:$0xff]  ;;  %v627_v3 = vld [vmem:[#allocation7 + $0x2e8] sm:$0xff] }
 0x11f   :  { %795 = vmatprep.subr.mxu1 %v601_v62  ;;  %723 = vmatpush1.msra.mxu0 %v582_v5  ;;  %v635_v62 = vld [vmem:[#allocation7 + $0x328] sm:$0xff]  ;;  %v626_v5 = vld [vmem:[#allocation7 + $0x2e0] sm:$0xff] }
 0x120   :  { %796 = vmatpush1.msra.mxu1 %v600_v63  ;;  %724 = vmatprep.subr.mxu0 %v575_v7  ;;  %v637_v63 = vld [vmem:[#allocation7 + $0x338] sm:$0xff]  ;;  %v619_v7 = vld [vmem:[#allocation7 + $0x2a8] sm:$0xff] }
 0x121   :  { %797 = vmatprep.subr.mxu1 %v593_v1  ;;  %725 = vmatpush1.msra.mxu0 %v574_v9  ;;  %v634_v1 = vld [vmem:[#allocation7 + $0x320] sm:$0xff] }
 0x122   :  { %798 = vmatpush1.msra.mxu1 %v592_v2  ;;  %726 = vmatprep.subr.mxu0 %v567_v11  ;;  %v636_v2 = vld [vmem:[#allocation7 + $0x330] sm:$0xff]  ;;  %v618_v9 = vld [vmem:[#allocation7 + $0x2a0] sm:$0xff]  ;;  %v611_v11 = vld [vmem:[#allocation7 + $0x268] sm:$0xff] }
 0x123   :  { %799 = vmatprep.subr.mxu1 %v585_v4  ;;  %727 = vmatpush1.msra.mxu0 %v566_v16  ;;  %v629_v4 = vld [vmem:[#allocation7 + $0x2f8] sm:$0xff]  ;;  %v610_v16 = vld [vmem:[#allocation7 + $0x260] sm:$0xff] }
 0x124   :  { %800 = vmatpush1.msra.mxu1 %v584_v6  ;;  %728 = vmatprep.subr.mxu0 %v559_v18  ;;  %v628_v6 = vld [vmem:[#allocation7 + $0x2f0] sm:$0xff]  ;;  %v603_v18 = vld [vmem:[#allocation7 + $0x228] sm:$0xff] }
 0x125   :  { %801 = vmatprep.subr.mxu1 %v577_v8  ;;  %729 = vmatpush1.msra.mxu0 %v558_v20  ;;  %v621_v8 = vld [vmem:[#allocation7 + $0x2b8] sm:$0xff]  ;;  %v602_v20 = vld [vmem:[#allocation7 + $0x220] sm:$0xff] }
 0x126   :  { %802 = vmatpush1.msra.mxu1 %v576_v10  ;;  %730 = vmatprep.subr.mxu0 %v551_v23  ;;  %v620_v10 = vld [vmem:[#allocation7 + $0x2b0] sm:$0xff]  ;;  %v595_v23 = vld [vmem:[#allocation7 + $0x1e8] sm:$0xff] }
 0x127   :  { %803 = vmatprep.subr.mxu1 %v569_v12  ;;  %731 = vmatpush1.msra.mxu0 %v550_v26  ;;  %v613_v12 = vld [vmem:[#allocation7 + $0x278] sm:$0xff]  ;;  %v594_v26 = vld [vmem:[#allocation7 + $0x1e0] sm:$0xff] }
 0x128   :  { %804 = vmatpush1.msra.mxu1 %v568_v17  ;;  %732 = vmatprep.subr.mxu0 %v543_v28  ;;  %v612_v17 = vld [vmem:[#allocation7 + $0x270] sm:$0xff]  ;;  %v587_v28 = vld [vmem:[#allocation7 + $0x1a8] sm:$0xff] }
 0x129   :  { %805 = vmatprep.subr.mxu1 %v561_v19  ;;  %733 = vmatpush1.msra.mxu0 %v542_v30  ;;  %v605_v19 = vld [vmem:[#allocation7 + $0x238] sm:$0xff]  ;;  %v586_v30 = vld [vmem:[#allocation7 + $0x1a0] sm:$0xff] }
 0x12a   :  { %806 = vmatpush1.msra.mxu1 %v560_v22  ;;  %734 = vmatprep.subr.mxu0 %v535_v32  ;;  %v604_v22 = vld [vmem:[#allocation7 + $0x230] sm:$0xff]  ;;  %v579_v32 = vld [vmem:[#allocation7 + $0x168] sm:$0xff] }
 0x12b   :  { %807 = vmatprep.subr.mxu1 %v553_v24  ;;  %735 = vmatpush1.msra.mxu0 %v534_v34  ;;  %v597_v24 = vld [vmem:[#allocation7 + $0x1f8] sm:$0xff]  ;;  %v578_v34 = vld [vmem:[#allocation7 + $0x160] sm:$0xff] }
 0x12c   :  { %808 = vmatpush1.msra.mxu1 %v552_v27  ;;  %858 = vmatprep.subr.mxu0 %v659_v36  ;;  %v596_v27 = vld [vmem:[#allocation7 + $0x1f0] sm:$0xff]  ;;  %v571_v36 = vld [vmem:[#allocation7 + $0x128] sm:$0xff] }
 0x12d   :  { %809 = vmatprep.subr.mxu1 %v545_v29  ;;  %v589_v29 = vld [vmem:[#allocation7 + $0x1b8] sm:$0xff] }
 0x12e   :  { %810 = vmatpush1.msra.mxu1 %v544_v31  ;;  %v588_v31 = vld [vmem:[#allocation7 + $0x1b0] sm:$0xff] }
 0x12f   :  { %811 = vmatprep.subr.mxu1 %v537_v33  ;;  %v581_v33 = vld [vmem:[#allocation7 + $0x178] sm:$0xff] }
 0x130   :  { %812 = vmatpush1.msra.mxu1 %v536_v35  ;;  %v580_v35 = vld [vmem:[#allocation7 + $0x170] sm:$0xff] }
 0x131   :  { %935 = vmatprep.subr.mxu1 %v661_v37  ;;  %v573_v37 = vld [vmem:[#allocation7 + $0x138] sm:$0xff] }
 0x1c9   :  { %v1499_v38 = vpop.f32.mrf.mxu0 }
 0x1cb   :  { %v1500_v39 = vpop.f32.mrf.mxu0 }
 0x1cc   :  { %v1501_v43 = vadd.f32 %v1500_v39, %v1499_v38  ;;  %v570_v38 = vld [vmem:[#allocation7 + $0x120] sm:$0xff]  ;;  %v572_v39 = vld [vmem:[#allocation7 + $0x130] sm:$0xff] }
 0x1cd   :  { %v1502_v40 = vpop.f32.mrf.mxu0 }
 0x1cf   :  { %v1503_v45 = vpop.f32.mrf.mxu0 }
 0x1d0   :  { %v1504_v53 = vadd.f32 %v1503_v45, %v1502_v40  ;;  %v563_v40 = vld [vmem:[#allocation7 + $0xe8] sm:$0xff]  ;;  %v557_v45 = vld [vmem:[#allocation7 + $0xb8] sm:$0xff] }
 0x1d1   :  { %v1537_v41 = vpop.f32.mrf.mxu1 }
 0x1d3   :  { %v1538_v42 = vpop.f32.mrf.mxu1 }
 0x1d4   :  { %v1539_v44 = vadd.f32 %v1538_v42, %v1537_v41  ;;  %v565_v41 = vld [vmem:[#allocation7 + $0xf8] sm:$0xff]  ;;  %v562_v42 = vld [vmem:[#allocation7 + $0xe0] sm:$0xff] }
 0x1d5   :  { %v1540_v46 = vpop.f32.mrf.mxu1 }
 0x1d6   :  { %v1884_v47 = vadd.f32 %v1539_v44, %v1501_v43  ;;  %v564_v43 = vld [vmem:[#allocation7 + $0xf0] sm:$0xff]  ;;  %v555_v44 = vld [vmem:[#allocation7 + $0xa8] sm:$0xff] }
 0x1d7   :  { %v1541_v50 = vpop.f32.mrf.mxu1 }
 0x1d8   :  { %v1542_v54 = vadd.f32 %v1541_v50, %v1540_v46  ;;  %769 = vmatmul.mubr.f32.vlgmr.msra.gmra.mxu0 %v1884_v47  ;;  %846 = vmatmul.mubr.f32.vlgmr.msra.gmra.mxu1 %v1884_v47  ;;  %v554_v46 = vld [vmem:[#allocation7 + $0xa0] sm:$0xff]  ;;  %v549_v50 = vld [vmem:[#allocation7 + $0x78] sm:$0xff] }
 0x1d9   :  { %859 = vmatpush1.msra.mxu0 %v658_v48  ;;  %936 = vmatpush1.msra.mxu1 %v660_v49  ;;  %v556_v48 = vld [vmem:[#allocation7 + $0xb0] sm:$0xff]  ;;  %v547_v49 = vld [vmem:[#allocation7 + $0x68] sm:$0xff] }
 0x1da   :  { %v1888_v57 = vadd.f32 %v1542_v54, %v1504_v53  ;;  %860 = vmatprep.subr.mxu0 %v651_v51  ;;  %937 = vmatprep.subr.mxu1 %v653_v52  ;;  %v546_v51 = vld [vmem:[#allocation7 + $0x60] sm:$0xff]  ;;  %v548_v52 = vld [vmem:[#allocation7 + $0x70] sm:$0xff]  ;;  %v539_v53 = vld [vmem:[#allocation7 + $0x28] sm:$0xff] }
 0x1db   :  { %861 = vmatpush1.msra.mxu0 %v650_v55  ;;  %938 = vmatpush1.msra.mxu1 %v652_v56  ;;  %v541_v54 = vld [vmem:[#allocation7 + $0x38] sm:$0xff]  ;;  %v538_v55 = vld [vmem:[#allocation7 + $0x20] sm:$0xff]  ;;  %v540_v56 = vld [vmem:[#allocation7 + $0x30] sm:$0xff] }
 0x1dc   :  { %774 = vmatprep.mubr.f32.mxu0 %v1765_v0  ;;  %851 = vmatprep.mubr.f32.mxu1 %v1765_v0 }
 0x1dd   :  { %862 = vmatprep.subr.mxu0 %v643_v58  ;;  %939 = vmatprep.subr.mxu1 %v645_v59  ;;  %v1068_v58 = vld [vmem:[#allocation8 + $0xf8] sm:$0xff]  ;;  %v1067_v59 = vld [vmem:[#allocation8 + $0xf0] sm:$0xff] }
 0x1de   :  { %775 = vmatmul.mubr.f32.gmra.mxu0 %v1888_v57  ;;  %852 = vmatmul.mubr.f32.gmra.mxu1 %v1888_v57 }
 0x1df   :  { %863 = vmatpush1.msra.mxu0 %v642_v60  ;;  %940 = vmatpush1.msra.mxu1 %v644_v61  ;;  %v1066_v60 = vld [vmem:[#allocation8 + $0xe8] sm:$0xff]  ;;  %v1065_v61 = vld [vmem:[#allocation8 + $0xe0] sm:$0xff] }
 0x1e0   :  { %864 = vmatprep.subr.mxu0 %v635_v62  ;;  %941 = vmatprep.subr.mxu1 %v637_v63  ;;  %v1064_v62 = vld [vmem:[#allocation8 + $0xd8] sm:$0xff]  ;;  %v1062_v63 = vld [vmem:[#allocation8 + $0xc8] sm:$0xff] }
 0x1e1   :  { %865 = vmatpush1.msra.mxu0 %v634_v1  ;;  %942 = vmatpush1.msra.mxu1 %v636_v2  ;;  %v1061_v1 = vld [vmem:[#allocation8 + $0xc0] sm:$0xff]  ;;  %v1060_v2 = vld [vmem:[#allocation8 + $0xb8] sm:$0xff] }
 0x1e2   :  { %866 = vmatprep.subr.mxu0 %v627_v3  ;;  %943 = vmatprep.subr.mxu1 %v629_v4  ;;  %v1058_v3 = vld [vmem:[#allocation8 + $0xa8] sm:$0xff]  ;;  %v1057_v4 = vld [vmem:[#allocation8 + $0xa0] sm:$0xff] }
 0x1e3   :  { %867 = vmatpush1.msra.mxu0 %v626_v5  ;;  %944 = vmatpush1.msra.mxu1 %v628_v6  ;;  %v1056_v5 = vld [vmem:[#allocation8 + $0x98] sm:$0xff]  ;;  %v1055_v6 = vld [vmem:[#allocation8 + $0x90] sm:$0xff] }
 0x1e4   :  { %868 = vmatprep.subr.mxu0 %v619_v7  ;;  %945 = vmatprep.subr.mxu1 %v621_v8  ;;  %v1054_v7 = vld [vmem:[#allocation8 + $0x88] sm:$0xff]  ;;  %v1053_v8 = vld [vmem:[#allocation8 + $0x80] sm:$0xff] }
 0x1e5   :  { %869 = vmatpush1.msra.mxu0 %v618_v9  ;;  %946 = vmatpush1.msra.mxu1 %v620_v10  ;;  %v1052_v9 = vld [vmem:[#allocation8 + $0x78] sm:$0xff]  ;;  %v1051_v10 = vld [vmem:[#allocation8 + $0x70] sm:$0xff] }
 0x1e6   :  { %870 = vmatprep.subr.mxu0 %v611_v11  ;;  %947 = vmatprep.subr.mxu1 %v613_v12  ;;  %v1050_v11 = vld [vmem:[#allocation8 + $0x68] sm:$0xff]  ;;  %v1049_v12 = vld [vmem:[#allocation8 + $0x60] sm:$0xff] }
 0x1e7   :  { %871 = vmatpush1.msra.mxu0 %v610_v16  ;;  %948 = vmatpush1.msra.mxu1 %v612_v17  ;;  %v1048_v16 = vld [vmem:[#allocation8 + $0x58] sm:$0xff]  ;;  %v1047_v17 = vld [vmem:[#allocation8 + $0x50] sm:$0xff] }
 0x1e8   :  { %872 = vmatprep.subr.mxu0 %v603_v18  ;;  %949 = vmatprep.subr.mxu1 %v605_v19  ;;  %v1046_v18 = vld [vmem:[#allocation8 + $0x48] sm:$0xff]  ;;  %v1045_v19 = vld [vmem:[#allocation8 + $0x40] sm:$0xff] }
 0x1e9   :  { %873 = vmatpush1.msra.mxu0 %v602_v20  ;;  %950 = vmatpush1.msra.mxu1 %v604_v22  ;;  %v1044_v20 = vld [vmem:[#allocation8 + $0x38] sm:$0xff]  ;;  %v1043_v22 = vld [vmem:[#allocation8 + $0x30] sm:$0xff] }
 0x1ea   :  { %874 = vmatprep.subr.mxu0 %v595_v23  ;;  %951 = vmatprep.subr.mxu1 %v597_v24  ;;  %v1042_v23 = vld [vmem:[#allocation8 + $0x28] sm:$0xff]  ;;  %v1041_v24 = vld [vmem:[#allocation8 + $0x20] sm:$0xff] }
 0x1eb   :  { %875 = vmatpush1.msra.mxu0 %v594_v26  ;;  %952 = vmatpush1.msra.mxu1 %v596_v27  ;;  %v1040_v26 = vld [vmem:[#allocation8 + $0x18] sm:$0xff]  ;;  %v1039_v27 = vld [vmem:[#allocation8 + $0x10] sm:$0xff] }
 0x1ec   :  { %876 = vmatprep.subr.mxu0 %v587_v28  ;;  %953 = vmatprep.subr.mxu1 %v589_v29  ;;  %v1038_v28 = vld [vmem:[#allocation8 + $0x8] sm:$0xff]  ;;  %v1037_v29 = vld [vmem:[#allocation8] sm:$0xff] }
 0x1ed   :  { %877 = vmatpush1.msra.mxu0 %v586_v30  ;;  %954 = vmatpush1.msra.mxu1 %v588_v31 }
 0x1ee   :  { %878 = vmatprep.subr.mxu0 %v579_v32  ;;  %955 = vmatprep.subr.mxu1 %v581_v33  ;;  %v662_v32 = vld [vmem:[%s1968_s5] sm:$0xff] }
 0x1ef   :  { %879 = vmatpush1.msra.mxu0 %v578_v34  ;;  %956 = vmatpush1.msra.mxu1 %v580_v35  ;;  %v671_v33 = vrot.slane %v662_v32, %v1866_v14 }
 0x1f0   :  { %880 = vmatprep.subr.mxu0 %v571_v36  ;;  %957 = vmatprep.subr.mxu1 %v573_v37  ;;  %v667_v36 = vrot.slane %v662_v32, %v1869_v15 }
 0x1f1   :  { %881 = vmatpush1.msra.mxu0 %v570_v38  ;;  %958 = vmatpush1.msra.mxu1 %v572_v39 }
 0x1f2   :  { %882 = vmatprep.subr.mxu0 %v563_v40  ;;  %959 = vmatprep.subr.mxu1 %v565_v41  ;;  %v675_v41 = vrot.slane %v662_v32, %v286_v25 }
 0x1f3   :  { %883 = vmatpush1.msra.mxu0 %v562_v42  ;;  %960 = vmatpush1.msra.mxu1 %v564_v43 }
 0x1f4   :  { %884 = vmatprep.subr.mxu0 %v555_v44  ;;  %961 = vmatprep.subr.mxu1 %v557_v45  ;;  %v682_v44 = vsub.s32 4, %v1863_v13 }
 0x1f5   :  { %885 = vmatpush1.msra.mxu0 %v554_v46  ;;  %962 = vmatpush1.msra.mxu1 %v556_v48  ;;  %v679_v48 = vrot.slane %v662_v32, %v290_v21 }
 0x1f6   :  { %886 = vmatprep.subr.mxu0 %v547_v49  ;;  %963 = vmatprep.subr.mxu1 %v549_v50  ;;  %v686_v50 = vsub.s32 5, %v1863_v13 }
 0x1f7   :  { %887 = vmatpush1.msra.mxu0 %v546_v51  ;;  %964 = vmatpush1.msra.mxu1 %v548_v52 }
 0x1f8   :  { %888 = vmatprep.subr.mxu0 %v539_v53  ;;  %965 = vmatprep.subr.mxu1 %v541_v54  ;;  %v683_v53 = vrot.slane %v662_v32, %v682_v44  ;;  %v690_v54 = vsub.s32 6, %v1863_v13  ;;  %v1199_v44 = vld [vmem:[#allocation8 + $0x1a0] sm:$0xff] }
 0x1f9   :  { %889 = vmatpush1.msra.mxu0 %v538_v55  ;;  %922 = vmatprep.mubr.f32.mxu0 %v1765_v0 }
 0x1fa   :  { %966 = vmatpush1.msra.mxu1 %v540_v56  ;;  %999 = vmatprep.mubr.f32.mxu1 %v1765_v0  ;;  %v691_v21 = vrot.slane %v662_v32, %v690_v54  ;;  %v1190_v54 = vld [vmem:[#allocation8 + $0x158] sm:$0xff] }
 0x1fb   :  { %923 = vmatmul.mubr.f32.vlgmr.msra.gmra.mxu0 %v1884_v47  ;;  %1000 = vmatmul.mubr.f32.vlgmr.msra.gmra.mxu1 %v1884_v47  ;;  %v1063_v47 = vld [vmem:[#allocation8 + $0xd0] sm:$0xff] }
 0x1fc   :  { %928 = vmatprep.mubr.f32.mxu0 %v1765_v0  ;;  %1005 = vmatprep.mubr.f32.mxu1 %v1765_v0 }
 0x1fd   :  { %1081 = vmatprep.subr.mxu0 %v1068_v58  ;;  %v687_v58 = vrot.slane %v662_v32, %v686_v50  ;;  %v1194_v50 = vld [vmem:[#allocation8 + $0x178] sm:$0xff] }
 0x1fe   :  { %1082 = vmatpush1.msra.mxu0 %v1067_v59  ;;  %v694_v59 = vsub.s32 7, %v1863_v13 }
 0x1ff   :  { %929 = vmatmul.mubr.f32.gmra.mxu0 %v1888_v57  ;;  %1006 = vmatmul.mubr.f32.gmra.mxu1 %v1888_v57  ;;  %v1059_v57 = vld [vmem:[#allocation8 + $0xb0] sm:$0xff] }
 0x200   :  { %1145 = vmatprep.mubr.f32.mxu0 %v1765_v0  ;;  %1288 = vmatprep.mubr.f32.mxu1 %v1765_v0 }
 0x201   :  { %1083 = vmatprep.subr.mxu0 %v1066_v60 }
 0x202   :  { %1084 = vmatpush1.msra.mxu0 %v1065_v61 }
 0x203   :  { %1085 = vmatprep.subr.mxu0 %v1064_v62 }
 0x204   :  { %1086 = vmatpush1.msra.mxu0 %v1063_v47 }
 0x205   :  { %1087 = vmatprep.subr.mxu0 %v1062_v63 }
 0x206   :  { %1088 = vmatpush1.msra.mxu0 %v1061_v1 }
 0x207   :  { %1089 = vmatprep.subr.mxu0 %v1060_v2 }
 0x208   :  { %1090 = vmatpush1.msra.mxu0 %v1059_v57 }
 0x209   :  { %1091 = vmatprep.subr.mxu0 %v1058_v3 }
 0x20a   :  { %1092 = vmatpush1.msra.mxu0 %v1057_v4 }
 0x20b   :  { %1093 = vmatprep.subr.mxu0 %v1056_v5  ;;  %v695_v5 = vrot.slane %v662_v32, %v694_v59  ;;  %v1185_v59 = vld [vmem:[#allocation8 + $0x130] sm:$0xff] }
 0x20c   :  { %1094 = vmatpush1.msra.mxu0 %v1055_v6 }
 0x20d   :  { %1095 = vmatprep.subr.mxu0 %v1054_v7 }
 0x20e   :  { %1096 = vmatpush1.msra.mxu0 %v1053_v8 }
 0x20f   :  { %1097 = vmatprep.subr.mxu0 %v1052_v9 }
 0x210   :  { %1098 = vmatpush1.msra.mxu0 %v1051_v10 }
 0x211   :  { %1099 = vmatprep.subr.mxu0 %v1050_v11 }
 0x212   :  { %1100 = vmatpush1.msra.mxu0 %v1049_v12 }
 0x213   :  { %1101 = vmatprep.subr.mxu0 %v1048_v16 }
 0x214   :  { %1102 = vmatpush1.msra.mxu0 %v1047_v17 }
 0x215   :  { %1103 = vmatprep.subr.mxu0 %v1046_v18 }
 0x216   :  { %1104 = vmatpush1.msra.mxu0 %v1045_v19  ;;  %v1460_v19 = vld [vmem:[%s1969_s6] ss:$0 sm:$0xff] }
 0x217   :  { %1105 = vmatprep.subr.mxu0 %v1044_v20 }
 0x218   :  { %1106 = vmatpush1.msra.mxu0 %v1043_v22 }
 0x219   :  { %1107 = vmatprep.subr.mxu0 %v1042_v23 }
 0x21a   :  { %1108 = vmatpush1.msra.mxu0 %v1041_v24 }
 0x21b   :  { %1109 = vmatprep.subr.mxu0 %v1040_v26 }
 0x21c   :  { %1110 = vmatpush1.msra.mxu0 %v1039_v27 }
 0x21d   :  { %1111 = vmatprep.subr.mxu0 %v1038_v28 }
 0x21e   :  { %1112 = vmatpush1.msra.mxu0 %v1037_v29 }
 0x298   :  { %v770_v30 = vpop.f32.mrf.mxu0  ;;  %v847_v34 = vpop.f32.mrf.mxu1 }
 0x299   :  { %v771_v40 = vadd.f32 %v770_v30, %v667_v36  ;;  %v848_v46 = vadd.f32 %v847_v34, %v675_v41  ;;  %v1209_v34 = vld [vmem:[#allocation8 + $0x1f0] sm:$0xff] }
 0x29a   :  { %v772_v31 = vpop.f32.mrf.mxu0  ;;  %v849_v38 = vpop.f32.mrf.mxu1 }
 0x29b   :  { %v773_v37 = vadd.f32 %v772_v31, %v671_v33  ;;  %v850_v56 = vadd.f32 %v849_v38, %v679_v48  ;;  %v1205_v38 = vld [vmem:[#allocation8 + $0x1d0] sm:$0xff] }
 0x29d   :  { %v1012_v42 = vmax.f32 %v771_v40, %v773_v37  ;;  %v1206_v37 = vld [vmem:[#allocation8 + $0x1d8] sm:$0xff]  ;;  %v1203_v40 = vld [vmem:[#allocation8 + $0x1c0] sm:$0xff] }
 0x29e   :  { %v776_v35 = vpop.f32.mrf.mxu0  ;;  %v853_v45 = vpop.f32.mrf.mxu1 }
 0x29f   :  { %v777_v49 = vadd.f32 %v776_v35, %v667_v36  ;;  %v1014_v51 = vmax.f32 %v1012_v42, %v848_v46  ;;  %v854_v25 = vadd.f32 %v853_v45, %v675_v41  ;;  %v1208_v35 = vld [vmem:[#allocation8 + $0x1e8] sm:$0xff]  ;;  %v1207_v36 = vld [vmem:[#allocation8 + $0x1e0] sm:$0xff]  ;;  %v1202_v41 = vld [vmem:[#allocation8 + $0x1b8] sm:$0xff] }
 0x2a0   :  { %v778_v39 = vpop.f32.mrf.mxu0  ;;  %v855_v55 = vpop.f32.mrf.mxu1  ;;  %v1201_v42 = vld [vmem:[#allocation8 + $0x1b0] sm:$0xff]  ;;  %v1198_v45 = vld [vmem:[#allocation8 + $0x198] sm:$0xff] }
 0x2a1   :  { %v779_v43 = vadd.f32 %v778_v39, %v671_v33  ;;  %v1016_v62 = vmax.f32 %v1014_v51, %v850_v56  ;;  %v856_v57 = vadd.f32 %v855_v55, %v679_v48  ;;  %v1210_v33 = vld [vmem:[#allocation8 + $0x1f8] sm:$0xff]  ;;  %v1204_v39 = vld [vmem:[#allocation8 + $0x1c8] sm:$0xff]  ;;  %v1197_v46 = vld [vmem:[#allocation8 + $0x190] sm:$0xff] }
 0x2a2   :  { %1224 = vmatprep.subr.mxu1 %v1210_v33  ;;  %v1196_v48 = vld [vmem:[#allocation8 + $0x188] sm:$0xff]  ;;  %v1193_v51 = vld [vmem:[#allocation8 + $0x170] sm:$0xff] }
 0x2a3   :  { %v1013_v52 = vmax.f32 %v777_v49, %v779_v43  ;;  %1225 = vmatpush1.msra.mxu1 %v1209_v34  ;;  %v1200_v43 = vld [vmem:[#allocation8 + $0x1a8] sm:$0xff]  ;;  %v1195_v49 = vld [vmem:[#allocation8 + $0x180] sm:$0xff]  ;;  %v1189_v55 = vld [vmem:[#allocation8 + $0x150] sm:$0xff] }
 0x2a4   :  { %1226 = vmatprep.subr.mxu1 %v1208_v35  ;;  %v1188_v56 = vld [vmem:[#allocation8 + $0x148] sm:$0xff]  ;;  %v1332_v35 = vld [vmem:[#allocation10 + $0x58] sm:$0xff] }
 0x2a5   :  { %v1015_v47 = vmax.f32 %v1013_v52, %v854_v25  ;;  %1227 = vmatpush1.msra.mxu1 %v1207_v36  ;;  %v1192_v52 = vld [vmem:[#allocation8 + $0x168] sm:$0xff]  ;;  %v1187_v25 = vld [vmem:[#allocation8 + $0x140] sm:$0xff] }
 0x2a6   :  { %1228 = vmatprep.subr.mxu1 %v1206_v37  ;;  %v1330_v36 = vld [vmem:[#allocation10 + $0x48] sm:$0xff]  ;;  %v1329_v37 = vld [vmem:[#allocation10 + $0x40] sm:$0xff] }
 0x2a7   :  { %v1017_v8 = vmax.f32 %v1015_v47, %v856_v57  ;;  %1229 = vmatpush1.msra.mxu1 %v1205_v38  ;;  %v1181_v47 = vld [vmem:[#allocation8 + $0x110] sm:$0xff]  ;;  %v1328_v38 = vld [vmem:[#allocation10 + $0x38] sm:$0xff] }
 0x2a8   :  { %1230 = vmatprep.subr.mxu1 %v1204_v39  ;;  %v1327_v39 = vld [vmem:[#allocation10 + $0x30] sm:$0xff] }
 0x2a9   :  { %1231 = vmatpush1.msra.mxu1 %v1203_v40  ;;  %v1326_v40 = vld [vmem:[#allocation10 + $0x28] sm:$0xff] }
 0x2aa   :  { %1232 = vmatprep.subr.mxu1 %v1202_v41  ;;  %v1325_v41 = vld [vmem:[#allocation10 + $0x20] sm:$0xff] }
 0x2ab   :  { %1233 = vmatpush1.msra.mxu1 %v1201_v42  ;;  %v1324_v42 = vld [vmem:[#allocation10 + $0x18] sm:$0xff] }
 0x2ac   :  { %1234 = vmatprep.subr.mxu1 %v1200_v43  ;;  %v1323_v43 = vld [vmem:[#allocation10 + $0x10] sm:$0xff] }
 0x2ad   :  { %1235 = vmatpush1.msra.mxu1 %v1199_v44  ;;  %v1322_v44 = vld [vmem:[#allocation10 + $0x8] sm:$0xff] }
 0x2ae   :  { %1236 = vmatprep.subr.mxu1 %v1198_v45  ;;  %v1321_v45 = vld [vmem:[#allocation10] sm:$0xff] }
 0x2af   :  { %1237 = vmatpush1.msra.mxu1 %v1197_v46  ;;  %v1463_v46 = vld [vmem:[%s1971_s8 + $0x2] sm:$0x3] }
 0x2b0   :  { %1238 = vmatprep.subr.mxu1 %v1196_v48  ;;  %v1221_v48 = vrot.slane %v1463_v46, %v1866_v14 }
 0x2b1   :  { %1239 = vmatpush1.msra.mxu1 %v1195_v49 }
 0x2b2   :  { %1240 = vmatprep.subr.mxu1 %v1194_v50 }
 0x2b3   :  { %1241 = vmatpush1.msra.mxu1 %v1193_v51 }
 0x2b4   :  { %1242 = vmatprep.subr.mxu1 %v1192_v52 }
 0x2bb   :  { %v924_v60 = vpop.f32.mrf.mxu0  ;;  %v1001_v61 = vpop.f32.mrf.mxu1 }
 0x2bc   :  { %v925_v63 = vadd.f32 %v924_v60, %v683_v53  ;;  %v1002_v9 = vadd.f32 %v1001_v61, %v691_v21  ;;  %v1184_v60 = vld [vmem:[#allocation8 + $0x128] sm:$0xff]  ;;  %v1183_v61 = vld [vmem:[#allocation8 + $0x120] sm:$0xff] }
 0x2bd   :  { %v926_v1 = vpop.f32.mrf.mxu0  ;;  %v1003_v2 = vpop.f32.mrf.mxu1 }
 0x2be   :  { %v1018_v3 = vmax.f32 %v1016_v62, %v925_v63  ;;  %v927_v4 = vadd.f32 %v926_v1, %v687_v58  ;;  %v1004_v13 = vadd.f32 %v1003_v2, %v695_v5  ;;  %v1182_v62 = vld [vmem:[#allocation8 + $0x118] sm:$0xff]  ;;  %v1180_v63 = vld [vmem:[#allocation8 + $0x108] sm:$0xff]  ;;  %v1069_v1 = vld [vmem:[%s1971_s8] sm:$0x3] }
 0x2bf   :  { %v930_v6 = vpop.f32.mrf.mxu0  ;;  %v1007_v7 = vpop.f32.mrf.mxu1  ;;  %v1078_v2 = vrot.slane %v1069_v1, %v1866_v14 }
 0x2c0   :  { %v1020_v10 = vmax.f32 %v1018_v3, %v927_v4  ;;  %v931_v11 = vadd.f32 %v930_v6, %v683_v53  ;;  %v1008_v23 = vadd.f32 %v1007_v7, %v691_v21  ;;  %v1191_v53 = vld [vmem:[#allocation8 + $0x160] sm:$0xff] }
 0x2c1   :  { %v932_v12 = vpop.f32.mrf.mxu0  ;;  %v1009_v20 = vpop.f32.mrf.mxu1  ;;  %1243 = vmatpush1.msra.mxu1 %v1191_v53  ;;  %v1179_v21 = vld [vmem:[#allocation8 + $0x100] sm:$0xff] }
 0x2c2   :  { %v1022_v16 = vmax.f32 %v1020_v10, %v1002_v9  ;;  %v1019_v17 = vmax.f32 %v1017_v8, %v931_v11  ;;  %v933_v18 = vadd.f32 %v932_v12, %v687_v58  ;;  %v1010_v27 = vadd.f32 %v1009_v20, %v695_v5  ;;  %1244 = vmatprep.subr.mxu1 %v1190_v54  ;;  %v1186_v58 = vld [vmem:[#allocation8 + $0x138] sm:$0xff] }
 0x2c3   :  { %1245 = vmatpush1.msra.mxu1 %v1189_v55  ;;  %v1074_v12 = vrot.slane %v1069_v1, %v1869_v15 }
 0x2c4   :  { %v1024_v22 = vmax.f32 %v1022_v16, %v1004_v13  ;;  %v1021_v24 = vmax.f32 %v1019_v17, %v933_v18  ;;  %1246 = vmatprep.subr.mxu1 %v1188_v56 }
 0x2c5   :  { %1247 = vmatpush1.msra.mxu1 %v1187_v25 }
 0x2c6   :  { %v1920_v26 = vadd.f32 %v1460_v19, %v1024_v22  ;;  %v1023_v28 = vmax.f32 %v1021_v24, %v1008_v23  ;;  %1248 = vmatprep.subr.mxu1 %v1186_v58 }
 0x2c7   :  { %1249 = vmatpush1.msra.mxu1 %v1185_v59  ;;  %v1217_v59 = vrot.slane %v1463_v46, %v1869_v15  ;;  %v1466_v15 = vld [vmem:[%s1973_s10] ss:$0 sm:$0xff] }
 0x2c8   :  { %v1035_v29 = vmax.f32 %v1920_v26, 0.0  ;;  %v1025_v30 = vmax.f32 %v1023_v28, %v1010_v27  ;;  %1250 = vmatprep.subr.mxu1 %v1184_v60  ;;  %v1336_v26 = vld [vmem:[#allocation10 + $0x78] sm:$0xff] }
 0x2c9   :  { %1251 = vmatpush1.msra.mxu1 %v1183_v61  ;;  %1561 = vmatprep.subr.mxu0 %v1336_v26 }
 0x2ca   :  { %1146 = vmatmul.mubr.f32.vlgmr.msra.gmra.mxu0 %v1035_v29  ;;  %v1925_v31 = vadd.f32 %v1460_v19, %v1025_v30  ;;  %1252 = vmatprep.subr.mxu1 %v1182_v62 }
 0x2cb   :  { %1151 = vmatprep.mubr.f32.mxu0 %v1765_v0  ;;  %1253 = vmatpush1.msra.mxu1 %v1181_v47 }
 0x2cc   :  { %v1036_v32 = vmax.f32 %v1925_v31, 0.0  ;;  %1254 = vmatprep.subr.mxu1 %v1180_v63  ;;  %1562 = vmatpush3.msra.mxu0 %v1336_v26  ;;  %v1334_v31 = vld [vmem:[#allocation10 + $0x68] sm:$0xff] }
 0x2cd   :  { %1255 = vmatpush1.msra.mxu1 %v1179_v21 }
 0x2ce   :  { %1152 = vmatmul.mubr.f32.gmra.mxu0 %v1036_v32 }
 0x38a   :  { %v1147_v57 = vpop.f32.mrf.mxu0 }
 0x38b   :  { %v1148_v17 = vadd.f32 %v1147_v57, %v1074_v12 }
 0x38c   :  { %v1149_v3 = vpop.f32.mrf.mxu0 }
 0x38d   :  { %v1150_v4 = vadd.f32 %v1149_v3, %v1078_v2  ;;  %v1158_v18 = vmax.f32 %v1148_v17, 0.0 }
 0x38e   :  { %v1153_v5 = vpop.f32.mrf.mxu0 }
 0x38f   :  { %v1461_v6 = vmul.f32 -1.442695, %v1150_v4  ;;  %v1154_v19 = vadd.f32 %v1153_v5, %v1074_v12  ;;  %v1172_v20 = vsub.f32 %v1035_v29, %v1158_v18  ;;  %v1335_v29 = vld [vmem:[#allocation10 + $0x70] sm:$0xff] }
 0x390   :  { %v1155_v7 = vpop.f32.mrf.mxu0  ;;  %1563 = vmatprep.subr.mxu0 %v1335_v29 }
 0x391   :  { %1610 = vpow2.f32 %v1461_v6  ;;  %v1156_v8 = vadd.f32 %v1155_v7, %v1078_v2  ;;  %v1159_v22 = vmax.f32 %v1154_v19, 0.0  ;;  %1564 = vmatpush3.msra.mxu0 %v1335_v29 }
 0x392   :  { %1565 = vmatprep.subr.mxu0 %v1334_v31 }
 0x393   :  { %v1462_v9 = vmul.f32 -1.442695, %v1156_v8  ;;  %v1173_v27 = vsub.f32 %v1036_v32, %v1159_v22  ;;  %1566 = vmatpush3.msra.mxu0 %v1334_v31  ;;  %v1333_v32 = vld [vmem:[#allocation10 + $0x60] sm:$0xff] }
 0x394   :  { %1567 = vmatprep.subr.mxu0 %v1333_v32 }
 0x395   :  { %1612 = vpow2.f32 %v1462_v9  ;;  %1568 = vmatpush3.msra.mxu0 %v1333_v32 }
 0x396   :  { %1569 = vmatprep.subr.mxu0 %v1332_v35 }
 0x397   :  { %1570 = vmatpush3.msra.mxu0 %v1332_v35 }
 0x39e   :  { %v1611_v10 = vpop.eup %1610 }
 0x39f   :  { %v1166_v11 = vadd.f32 1.0, %v1611_v10 }
 0x3a1   :  { %1614 = vrcp.f32 %v1166_v11 }
 0x3a2   :  { %v1613_v13 = vpop.eup %1612 }
 0x3a3   :  { %v1167_v16 = vadd.f32 1.0, %v1613_v13 }
 0x3a5   :  { %1616 = vrcp.f32 %v1167_v16 }
 0x3ae   :  { %v1615_v23 = vpop.eup %1614 }
 0x3af   :  { %v1174_v24 = vmul.f32 %v1615_v23, %v1172_v20 }
 0x3b1   :  { %v1940_v28 = vadd.f32 %v1174_v24, %v1158_v18 }
 0x3b2   :  { %v1617_v30 = vpop.eup %1616 }
 0x3b3   :  { %1289 = vmatmul.mubr.f32.vlgmr.msra.gmra.mxu1 %v1940_v28  ;;  %v1175_v33 = vmul.f32 %v1617_v30, %v1173_v27 }
 0x3b4   :  { %1294 = vmatprep.mubr.f32.mxu1 %v1765_v0  ;;  %v1331_v0 = vld [vmem:[#allocation10 + $0x50] sm:$0xff] }
 0x3b5   :  { %v1944_v34 = vadd.f32 %v1175_v33, %v1159_v22  ;;  %1571 = vmatprep.subr.mxu0 %v1331_v0 }
 0x3b6   :  { %1572 = vmatpush3.msra.mxu0 %v1331_v0 }
 0x3b7   :  { %1295 = vmatmul.mubr.f32.gmra.mxu1 %v1944_v34  ;;  %1573 = vmatprep.subr.mxu0 %v1330_v36 }
 0x3b8   :  { %1574 = vmatpush3.msra.mxu0 %v1330_v36 }
 0x3b9   :  { %1575 = vmatprep.subr.mxu0 %v1329_v37 }
 0x3ba   :  { %1576 = vmatpush3.msra.mxu0 %v1329_v37 }
 0x3bb   :  { %1577 = vmatprep.subr.mxu0 %v1328_v38 }
 0x3bc   :  { %1578 = vmatpush3.msra.mxu0 %v1328_v38 }
 0x3bd   :  { %1579 = vmatprep.subr.mxu0 %v1327_v39 }
 0x3be   :  { %1580 = vmatpush3.msra.mxu0 %v1327_v39 }
 0x3bf   :  { %1581 = vmatprep.subr.mxu0 %v1326_v40 }
 0x3c0   :  { %1582 = vmatpush3.msra.mxu0 %v1326_v40 }
 0x3c1   :  { %1583 = vmatprep.subr.mxu0 %v1325_v41 }
 0x3c2   :  { %1584 = vmatpush3.msra.mxu0 %v1325_v41 }
 0x3c3   :  { %1585 = vmatprep.subr.mxu0 %v1324_v42 }
 0x3c4   :  { %1586 = vmatpush3.msra.mxu0 %v1324_v42 }
 0x3c5   :  { %1587 = vmatprep.subr.mxu0 %v1323_v43 }
 0x3c6   :  { %1588 = vmatpush3.msra.mxu0 %v1323_v43 }
 0x3c7   :  { %1589 = vmatprep.subr.mxu0 %v1322_v44 }
 0x3c8   :  { %1590 = vmatpush3.msra.mxu0 %v1322_v44 }
 0x3c9   :  { %1591 = vmatprep.subr.mxu0 %v1321_v45 }
 0x3ca   :  { %1592 = vmatpush3.msra.mxu0 %v1321_v45 }
 0x473   :  { %v1290_v49 = vpop.f32.mrf.mxu1 }
 0x474   :  { %v1291_v62 = vadd.f32 %v1290_v49, %v1217_v59 }
 0x475   :  { %v1292_v50 = vpop.f32.mrf.mxu1 }
 0x476   :  { %v1293_v51 = vadd.f32 %v1292_v50, %v1221_v48  ;;  %v1301_v14 = vmax.f32 %v1291_v62, 0.0 }
 0x477   :  { %v1296_v52 = vpop.f32.mrf.mxu1 }
 0x478   :  { %v1464_v53 = vmul.f32 -1.442695, %v1293_v51  ;;  %v1297_v47 = vadd.f32 %v1296_v52, %v1217_v59  ;;  %v1315_v63 = vsub.f32 %v1940_v28, %v1301_v14 }
 0x479   :  { %v1298_v54 = vpop.f32.mrf.mxu1 }
 0x47a   :  { %1618 = vpow2.f32 %v1464_v53  ;;  %v1299_v55 = vadd.f32 %v1298_v54, %v1221_v48  ;;  %v1302_v21 = vmax.f32 %v1297_v47, 0.0 }
 0x47c   :  { %v1465_v56 = vmul.f32 -1.442695, %v1299_v55  ;;  %v1316_v57 = vsub.f32 %v1944_v34, %v1302_v21 }
 0x47e   :  { %1620 = vpow2.f32 %v1465_v56 }
 0x487   :  { %v1619_v25 = vpop.eup %1618 }
 0x488   :  { %v1309_v58 = vadd.f32 1.0, %v1619_v25 }
 0x48a   :  { %1622 = vrcp.f32 %v1309_v58 }
 0x48b   :  { %v1621_v60 = vpop.eup %1620 }
 0x48c   :  { %v1310_v61 = vadd.f32 1.0, %v1621_v60 }
 0x48e   :  { %1624 = vrcp.f32 %v1310_v61 }
 0x497   :  { %v1623_v1 = vpop.eup %1622 }
 0x498   :  { %v1317_v2 = vmul.f32 %v1623_v1, %v1315_v63 }
 0x49a   :  { %v1319_v3 = vadd.f32 %v1317_v2, %v1301_v14 }
 0x49b   :  { %v1625_v4 = vpop.eup %1624 }
 0x49c   :  { %1593 = vmatprep.mubr.f32.mxu0 %v1319_v3  ;;  %v1318_v5 = vmul.f32 %v1625_v4, %v1316_v57 }
 0x49e   :  { %v1320_v6 = vadd.f32 %v1318_v5, %v1302_v21 }
 0x4a0   :  { %1594 = vmatmul.mubr.f32.vlgmr.msra.gmra.mxu0 %v1320_v6 }
 0x560   :  { %v1595_v7 = vpop.f32.mrf.mxu0 }
 0x561   :  { %v1416_v8 = vadd.f32 %v1595_v7, %v1466_v15 }
 0x562   :  { %v1410_v9 = vpop.f32.mrf.mxu0 }
 0x563   :  { %1420 = vst [vmem:[#allocation11 + $0x8] sm:$0xff] %v1416_v8  ;;  %v1411_v10 = vadd.f32 %v1466_v15, %v1410_v9 }
 0x565   :  { %1419 = vst [vmem:[#allocation11] sm:$0xff] %v1411_v10 }
 0x566   :  { %1737 = shalt.err (!%p1734_p1)
}
 0x567   :  { %1432 = dma.vmem_to_hbm [thread:$0]  %s1427_s18, 256, %s1974_s11, [#allocation4], %s1755_s20, %s1755_s20, %s1756_s21  }
 0x568   :  { %1752 = dma.done.wait [#allocation4], 256  }
 0x569   :  { %1753 = vsyncadd [#allocation4], 4294967040 }
 0x56a   :  { %1436 = vsyncpa [#allocation3], 1 }
 0x56b   :  { %1437 = vsyncpa [#allocation6], 1 }
 0x56c   :  { %1438 = vsyncpa [#allocation9], 1 }
 0x56d   :  { %1439 = vsyncpa [#allocation4], 1 }

</bundles_post_ra>
